<compile_context>
chip_gen: v7x
topology: tpu7x:2x2x1
jax: 0.10.0
libtpu: 0.0.40
codegen_flags: <defaults>
</compile_context>

<pallas_src>
import jax
import jax.numpy as jnp
from jax.experimental import pallas as pl
from jax.experimental.pallas import tpu as pltpu

# ----- small config consistent with the module's forward -----
N = 2                 # batch
CIN = 4               # input_channels
COUT = 8              # output_channels (divisible by n_heads)
NH = 4                # n_heads
HD = COUT // NH       # head dim
TEMB = 32             # time_embedding size (even)
H = W = 8             # input spatial
UP = 2                # upsample_scale
HH, WW = H * UP, W * UP
HWIN = H * W          # 64
L = HH * WW           # 256  (lane-dense: 2 x 128)
EPS = 1e-5


# ---------------------------------------------------------------- kernel ----
def decoder_block_kernel(x_ref, prev_ref, temb_ref,
                         gath_ref, wlane_ref, mask_ref,
                         packA_ref, winb_ref, wout_ref,
                         o_ref):
    f32 = jnp.float32
    bf16 = jnp.bfloat16
    x = x_ref[0]                                            # (CIN, H*W)

    # ---- small constants from the packed (8,128) buffer (static slices) ----
    wc   = packA_ref[:, 0:36]                               # (COUT, 9*CIN)
    wp   = packA_ref[:, 36:68]                              # (COUT, TEMB)
    bc   = packA_ref[:, 68:69]
    bp   = packA_ref[:, 69:70]
    lng  = packA_ref[:, 70:71]
    lnb  = packA_ref[:, 71:72]
    bout = packA_ref[:, 72:73]
    bt   = packA_ref[0:CIN, 73:74]                          # (CIN, 1)

    # ---- ConvTranspose2d(k=2,s=2): one gather matmul + per-lane 4x4 mix ----
    xg = jnp.dot(x, gath_ref[...], preferred_element_type=f32)      # (CIN, L)
    y = jnp.zeros((CIN, L), f32)
    for ci in range(CIN):                                   # static, 4 VPU MACs
        y = y + wlane_ref[ci] * xg[ci:ci + 1, :]            # (CIN_out, L)
    y = y + bt

    # ---- InstanceNorm2d #1: per channel over the L spatial lanes ----
    mu = jnp.mean(y, axis=1, keepdims=True)
    d = y - mu
    var = jnp.mean(d * d, axis=1, keepdims=True)
    yn = d * jax.lax.rsqrt(var + EPS)

    # ---- Conv2d 3x3, pad=1: stack 9 rolled+masked taps -> ONE K=36 matmul ----
    taps = []
    k = 0
    for di in (-1, 0, 1):
        for dj in (-1, 0, 1):
            shift = di * WW + dj
            if shift == 0:
                taps.append(yn)
            else:
                taps.append(pltpu.roll(yn, (-shift) % L, axis=1) * mask_ref[k])
            k += 1
    stacked = jnp.concatenate(taps, axis=0)                 # (9*CIN, L)
    conv = jnp.dot(wc, stacked, preferred_element_type=f32) + bc    # (COUT, L)

    # ---- InstanceNorm2d #2 + prev_fmap residual + time-embedding bias ----
    mu2 = jnp.mean(conv, axis=1, keepdims=True)
    d2 = conv - mu2
    var2 = jnp.mean(d2 * d2, axis=1, keepdims=True)
    convn = d2 * jax.lax.rsqrt(var2 + EPS)

    e = temb_ref[0]                                         # (1, TEMB)
    e = e * jax.nn.sigmoid(e)                               # SiLU
    tproj = jnp.sum(wp * e, axis=1, keepdims=True) + bp     # (COUT, 1)

    z = convn + prev_ref[0] + tproj                         # (COUT, L)

    # ---- LayerNorm over channels (per spatial lane) ----
    mu3 = jnp.mean(z, axis=0, keepdims=True)
    var3 = jnp.mean((z - mu3) ** 2, axis=0, keepdims=True)
    xn = (z - mu3) * jax.lax.rsqrt(var3 + EPS) * lng + lnb

    # ---- 4-head self-attention: per-head fori_loop (bounded live ranges), ----
    # ---- bf16 score / PV matmul operands with f32 accumulation            ----
    def head_body(h, proj_acc):
        wb = winb_ref[h]                                    # (3*HD, COUT+1): [W | b]
        qkv = (jnp.dot(wb[:, :COUT], xn, preferred_element_type=f32)
               + wb[:, COUT:])                              # (3*HD, L); q already scaled
        q = qkv[0:HD].astype(bf16)
        kk = qkv[HD:2 * HD].astype(bf16)
        v = qkv[2 * HD:3 * HD].astype(bf16)
        s = jax.lax.dot_general(q, kk, (((0,), (0,)), ((), ())),
                                preferred_element_type=f32)          # (L, L)
        m = jnp.max(s, axis=1, keepdims=True)
        p = jnp.exp(s - m)                                   # f32 exp (v5e-safe)
        denom = jnp.sum(p, axis=1, keepdims=True)
        probs = (p * pl.reciprocal(denom, approx=True)).astype(bf16)
        head = jax.lax.dot_general(v, probs, (((1,), (1,)), ((), ())),
                                   preferred_element_type=f32)       # (HD, L)
        # out-proj slice for this head, accumulated (== w_out @ concat(heads))
        return proj_acc + jnp.dot(wout_ref[h], head, preferred_element_type=f32)

    proj = jax.lax.fori_loop(0, NH, head_body, jnp.zeros((COUT, L), f32)) + bout

    o_ref[0] = jnp.maximum(proj + z, 0.0)                   # residual + ReLU


# -------------------------------------------------------------- wrapper ----
def _sinusoidal_embedding(t):
    # TODO(synk): SinusoidalEmbedding stays as vectorized wrapper-side jnp
    # (tiny per-sample sin/cos table), not a Pallas kernel.
    i = jnp.arange(TEMB // 2, dtype=jnp.float32)
    freqs = 1.0 / (10000.0 ** (2.0 * i / TEMB))
    ang = t.astype(jnp.float32)[:, None] * freqs[None, :]
    emb = jnp.zeros((t.shape[0], TEMB), jnp.float32)
    emb = emb.at[:, 0::2].set(jnp.sin(ang)).at[:, 1::2].set(jnp.cos(ang))
    return emb


def decoder_block_forward(fmap, prev_fmap, t, p):
    """fmap: (N,CIN,H,W), prev_fmap: (N,COUT,HH,WW), t: (N,) -> (N,COUT,HH,WW)."""
    f32 = jnp.float32
    x = fmap.reshape(N, CIN, HWIN).astype(f32)              # (N, CIN, 64)
    prev = prev_fmap.reshape(N, COUT, L).astype(f32)        # (N, COUT, 256)
    temb = _sinusoidal_embedding(t).reshape(N, 1, TEMB)

    # --- transposed-conv constants: gather matrix + per-lane channel mix ---
    l_idx = jnp.arange(L)
    li, lj = l_idx // WW, l_idx % WW
    src = (li // UP) * W + (lj // UP)                       # source pixel per lane
    kh, kw = li % UP, lj % UP                               # tap per lane
    gath = (jnp.arange(HWIN)[:, None] == src[None, :]).astype(f32)   # (HWIN, L)
    wlane = p["wt"][:, :, kh, kw]                           # (CIN_in, CIN_out, L)

    # boundary-validity masks for the 9 conv taps (zero padding)
    masks = jnp.stack([
        ((li + di >= 0) & (li + di < HH) & (lj + dj >= 0) & (lj + dj < WW)
         ).astype(f32)
        for di in (-1, 0, 1) for dj in (-1, 0, 1)]).reshape(9, 1, L)

    # 3x3 conv weight stacked along the contraction axis (COUT, 9*CIN)
    wc_k = jnp.transpose(p["wc"], (2, 3, 0, 1)).reshape(9, COUT, CIN)
    wc_stacked = jnp.transpose(wc_k, (1, 0, 2)).reshape(COUT, 9 * CIN)

    # packed small-constant buffer (8, 128): weights + per-channel vectors
    packA = jnp.zeros((8, 128), f32)
    packA = packA.at[:, 0:36].set(wc_stacked)
    packA = packA.at[:, 36:68].set(p["wp"])
    packA = packA.at[:, 68].set(p["bc"])
    packA = packA.at[:, 69].set(p["bp"])
    packA = packA.at[:, 70].set(p["ln_g"])
    packA = packA.at[:, 71].set(p["ln_b"])
    packA = packA.at[:, 72].set(p["b_out"])
    packA = packA.at[0:CIN, 73].set(p["bt"])

    # per-head attention weights; 1/sqrt(HD) folded into the q rows + q bias
    scale = 1.0 / (HD ** 0.5)
    w_in_s = p["w_in"].at[:COUT].multiply(scale)
    b_in_s = p["b_in"].at[:COUT].multiply(scale)
    winb, wout_r = [], []
    for h in range(NH):
        sl0 = slice(h * HD, (h + 1) * HD)
        rows = jnp.concatenate([w_in_s[sl0],
                                w_in_s[COUT + h * HD:COUT + (h + 1) * HD],
                                w_in_s[2 * COUT + h * HD:2 * COUT + (h + 1) * HD]],
                               axis=0)                       # (3*HD, COUT)
        brows = jnp.concatenate([b_in_s[sl0],
                                 b_in_s[COUT + h * HD:COUT + (h + 1) * HD],
                                 b_in_s[2 * COUT + h * HD:2 * COUT + (h + 1) * HD]]
                                )[:, None]                   # (3*HD, 1)
        winb.append(jnp.concatenate([rows, brows], axis=1))  # (3*HD, COUT+1)
        wout_r.append(p["w_out"][:, sl0])                    # (COUT, HD)
    winb_r = jnp.stack(winb)                                 # (NH, 3*HD, COUT+1)
    wout_r = jnp.stack(wout_r)                               # (NH, COUT, HD)

    batch3 = lambda shape: pl.BlockSpec(shape, lambda n: (n, 0, 0))
    const2 = lambda shape: pl.BlockSpec(shape, lambda n: (0, 0))
    const3 = lambda shape: pl.BlockSpec(shape, lambda n: (0, 0, 0))

    out = pl.pallas_call(
        decoder_block_kernel,
        grid=(N,),
        in_specs=[batch3((1, CIN, HWIN)),           # x
                  batch3((1, COUT, L)),             # prev_fmap
                  batch3((1, 1, TEMB)),             # sinusoidal embedding
                  const2((HWIN, L)),                # gather matrix (0/1)
                  const3((CIN, CIN, L)),            # per-lane channel-mix weights
                  const3((9, 1, L)),                # conv boundary masks
                  const2((8, 128)),                 # packed small constants
                  const3((NH, 3 * HD, COUT + 1)),   # per-head [W_in | b_in]
                  const3((NH, COUT, HD))],          # per-head W_out slices
        out_specs=pl.BlockSpec((1, COUT, L), lambda n: (n, 0, 0)),
        out_shape=jax.ShapeDtypeStruct((N, COUT, L), f32),
        compiler_params=pltpu.CompilerParams(
            dimension_semantics=("parallel",)),
    )(x, prev, temb, gath, wlane, masks, packA, winb_r, wout_r)

    return out.reshape(N, COUT, HH, WW)             # (C, L) layout is already NCHW


# ----------------------------------------------------- pure-JAX reference ----
def reference_forward(fmap, prev_fmap, t, p):
    x = jnp.transpose(fmap, (0, 2, 3, 1)).astype(jnp.float32)
    y = jnp.einsum('nhwi,iokl->nhkwlo', x, p["wt"]).reshape(N, HH, WW, CIN) + p["bt"]

    def inorm(a):
        mu = jnp.mean(a, axis=(1, 2), keepdims=True)
        var = jnp.mean((a - mu) ** 2, axis=(1, 2), keepdims=True)
        return (a - mu) * jax.lax.rsqrt(var + EPS)

    y = inorm(y)
    conv = jax.lax.conv_general_dilated(
        y, jnp.transpose(p["wc"], (2, 3, 1, 0)), (1, 1), 'SAME',
        dimension_numbers=('NHWC', 'HWIO', 'NHWC')) + p["bc"]
    conv = inorm(conv)

    temb = _sinusoidal_embedding(t)
    tproj = jax.nn.silu(temb) @ p["wp"].T + p["bp"]
    z = conv + jnp.transpose(prev_fmap, (0, 2, 3, 1)) + tproj[:, None, None, :]

    zs = z.reshape(N, L, COUT)
    mu = jnp.mean(zs, -1, keepdims=True)
    var = jnp.mean((zs - mu) ** 2, -1, keepdims=True)
    xn = (zs - mu) * jax.lax.rsqrt(var + EPS) * p["ln_g"] + p["ln_b"]
    qkv = xn @ p["w_in"].T + p["b_in"]
    q, k, v = jnp.split(qkv, 3, axis=-1)
    qh = q.reshape(N, L, NH, HD); kh = k.reshape(N, L, NH, HD); vh = v.reshape(N, L, NH, HD)
    s = jnp.einsum('blhd,bmhd->bhlm', qh, kh) / jnp.sqrt(float(HD))
    a = jax.nn.softmax(s, axis=-1)
    o = jnp.einsum('bhlm,bmhd->blhd', a, vh).reshape(N, L, COUT)
    o = o @ p["w_out"].T + p["b_out"] + zs
    out = jnp.maximum(o, 0.0).reshape(N, HH, WW, COUT)
    return jnp.transpose(out, (0, 3, 1, 2))


# ------------------------------------------------------------------- main ----
def init_params(key):
    ks = jax.random.split(key, 12)
    s = 0.2
    return dict(
        wt=jax.random.normal(ks[0], (CIN, CIN, UP, UP), jnp.float32) * s,      # ConvTranspose2d
        bt=jax.random.normal(ks[1], (CIN,), jnp.float32) * s,
        wc=jax.random.normal(ks[2], (COUT, CIN, 3, 3), jnp.float32) * s,       # Conv2d
        bc=jax.random.normal(ks[3], (COUT,), jnp.float32) * s,
        wp=jax.random.normal(ks[4], (COUT, TEMB), jnp.float32) * s,            # time Linear
        bp=jax.random.normal(ks[5], (COUT,), jnp.float32) * s,
        ln_g=jnp.ones((COUT,), jnp.float32) + 0.1 * jax.random.normal(ks[6], (COUT,)),
        ln_b=0.1 * jax.random.normal(ks[7], (COUT,), jnp.float32),
        w_in=jax.random.normal(ks[8], (3 * COUT, COUT), jnp.float32) * s,      # MHA in_proj
        b_in=jax.random.normal(ks[9], (3 * COUT,), jnp.float32) * s,
        w_out=jax.random.normal(ks[10], (COUT, COUT), jnp.float32) * s,        # MHA out_proj
        b_out=jax.random.normal(ks[11], (COUT,), jnp.float32) * s,
    )


if __name__ == "__main__":
    key = jax.random.PRNGKey(0)
    kp, k1, k2, k3 = jax.random.split(key, 4)
    params = init_params(kp)

    fmap = jax.random.normal(k1, (N, CIN, H, W), jnp.float32)
    prev_fmap = jax.random.normal(k2, (N, COUT, HH, WW), jnp.float32)
    t = jax.random.randint(k3, (N,), 0, 1000).astype(jnp.float32)

    fwd = jax.jit(decoder_block_forward)
    out = jax.block_until_ready(fwd(fmap, prev_fmap, t, params))
    assert out.shape == (N, COUT, HH, WW)

    # f32 reference; tolerance covers MXU f32 emulation + the bf16 attention
    # score/PV operands (errors are O(1e-3) at these O(1) magnitudes).
    with jax.default_matmul_precision("float32"):
        ref = jax.block_until_ready(reference_forward(fmap, prev_fmap, t, params))
    max_diff = float(jnp.max(jnp.abs(out - ref)))
    assert max_diff < 2e-2, f"mismatch vs reference: {max_diff}"

    print("KERNEL_OK")
</pallas_src>

<mosaic_0001>
module attributes {stable_mosaic.version = 11 : i64} {
  func.func @decoder_block_kernel(%arg0: i32, %arg1: memref<1x4x64xf32, #tpu.memory_space<vmem>>, %arg2: memref<1x8x256xf32, #tpu.memory_space<vmem>>, %arg3: memref<1x1x32xf32, #tpu.memory_space<vmem>>, %arg4: memref<64x256xf32, #tpu.memory_space<vmem>>, %arg5: memref<4x4x256xf32, #tpu.memory_space<vmem>>, %arg6: memref<9x1x256xf32, #tpu.memory_space<vmem>>, %arg7: memref<8x128xf32, #tpu.memory_space<vmem>>, %arg8: memref<4x6x9xf32, #tpu.memory_space<vmem>>, %arg9: memref<4x8x2xf32, #tpu.memory_space<vmem>>, %arg10: memref<1x8x256xf32, #tpu.memory_space<vmem>>) attributes {dimension_semantics = [#tpu.dimension_semantics<parallel>], iteration_bounds = array<i64: 2>, scalar_prefetch = 0 : i64, scratch_operands = 0 : i64, tpu.core_type = #tpu.core_type<tc>, window_params = [{transform_indices = @transform_0, window_bounds = array<i64: 1, 4, 64>}, {transform_indices = @transform_1, window_bounds = array<i64: 1, 8, 256>}, {transform_indices = @transform_2, window_bounds = array<i64: 1, 1, 32>}, {pipeline_mode = #tpu.pipeline_mode<synchronous>, transform_indices = @transform_3, window_bounds = array<i64: 64, 256>}, {pipeline_mode = #tpu.pipeline_mode<synchronous>, transform_indices = @transform_4, window_bounds = array<i64: 4, 4, 256>}, {pipeline_mode = #tpu.pipeline_mode<synchronous>, transform_indices = @transform_5, window_bounds = array<i64: 9, 1, 256>}, {pipeline_mode = #tpu.pipeline_mode<synchronous>, transform_indices = @transform_6, window_bounds = array<i64: 8, 128>}, {pipeline_mode = #tpu.pipeline_mode<synchronous>, transform_indices = @transform_7, window_bounds = array<i64: 4, 6, 9>}, {pipeline_mode = #tpu.pipeline_mode<synchronous>, transform_indices = @transform_8, window_bounds = array<i64: 4, 8, 2>}, {transform_indices = @transform_9, window_bounds = array<i64: 1, 8, 256>}]} {
    %c0 = arith.constant 0 : index
    %c0_0 = arith.constant 0 : index
    %c0_1 = arith.constant 0 : index
    %0 = vector.load %arg1[%c0, %c0_0, %c0_1] : memref<1x4x64xf32, #tpu.memory_space<vmem>>, vector<1x4x64xf32>
    %1 = vector.shape_cast %0 : vector<1x4x64xf32> to vector<4x64xf32>
    %c0_2 = arith.constant 0 : index
    %c0_3 = arith.constant 0 : index
    %2 = vector.load %arg7[%c0_2, %c0_3] : memref<8x128xf32, #tpu.memory_space<vmem>>, vector<8x36xf32>
    %c0_4 = arith.constant 0 : index
    %c36 = arith.constant 36 : index
    %3 = vector.load %arg7[%c0_4, %c36] : memref<8x128xf32, #tpu.memory_space<vmem>>, vector<8x32xf32>
    %c0_5 = arith.constant 0 : index
    %c68 = arith.constant 68 : index
    %4 = vector.load %arg7[%c0_5, %c68] : memref<8x128xf32, #tpu.memory_space<vmem>>, vector<8x1xf32>
    %c0_6 = arith.constant 0 : index
    %c69 = arith.constant 69 : index
    %5 = vector.load %arg7[%c0_6, %c69] : memref<8x128xf32, #tpu.memory_space<vmem>>, vector<8x1xf32>
    %c0_7 = arith.constant 0 : index
    %c70 = arith.constant 70 : index
    %6 = vector.load %arg7[%c0_7, %c70] : memref<8x128xf32, #tpu.memory_space<vmem>>, vector<8x1xf32>
    %c0_8 = arith.constant 0 : index
    %c71 = arith.constant 71 : index
    %7 = vector.load %arg7[%c0_8, %c71] : memref<8x128xf32, #tpu.memory_space<vmem>>, vector<8x1xf32>
    %c0_9 = arith.constant 0 : index
    %c72 = arith.constant 72 : index
    %8 = vector.load %arg7[%c0_9, %c72] : memref<8x128xf32, #tpu.memory_space<vmem>>, vector<8x1xf32>
    %c0_10 = arith.constant 0 : index
    %c73 = arith.constant 73 : index
    %9 = vector.load %arg7[%c0_10, %c73] : memref<8x128xf32, #tpu.memory_space<vmem>>, vector<4x1xf32>
    %c0_11 = arith.constant 0 : index
    %c0_12 = arith.constant 0 : index
    %10 = vector.load %arg4[%c0_11, %c0_12] : memref<64x256xf32, #tpu.memory_space<vmem>>, vector<64x256xf32>
    %cst = arith.constant dense<0.000000e+00> : vector<4x256xf32>
    %11 = tpu.matmul %1, %10, %cst {dimension_numbers = #tpu.dot_dimension_numbers<[1], [0], [0], [1], [0, 0, 1, 1], [], []>} : vector<4x64xf32>, vector<64x256xf32>, vector<4x256xf32> -> vector<4x256xf32>
    %cst_13 = arith.constant 0.000000e+00 : f32
    %12 = vector.broadcast %cst_13 : f32 to vector<4x256xf32>
    %c0_14 = arith.constant 0 : index
    %c0_15 = arith.constant 0 : index
    %c0_16 = arith.constant 0 : index
    %13 = vector.load %arg5[%c0_14, %c0_15, %c0_16] : memref<4x4x256xf32, #tpu.memory_space<vmem>>, vector<1x4x256xf32>
    %14 = vector.shape_cast %13 : vector<1x4x256xf32> to vector<4x256xf32>
    %15 = vector.extract_strided_slice %11 {offsets = [0, 0], sizes = [1, 256], strides = [1, 1]} : vector<4x256xf32> to vector<1x256xf32>
    %16 = vector.broadcast %15 : vector<1x256xf32> to vector<4x256xf32>
    %17 = arith.mulf %14, %16 : vector<4x256xf32>
    %18 = arith.addf %12, %17 : vector<4x256xf32>
    %c1 = arith.constant 1 : index
    %c0_17 = arith.constant 0 : index
    %c0_18 = arith.constant 0 : index
    %19 = vector.load %arg5[%c1, %c0_17, %c0_18] : memref<4x4x256xf32, #tpu.memory_space<vmem>>, vector<1x4x256xf32>
    %20 = vector.shape_cast %19 : vector<1x4x256xf32> to vector<4x256xf32>
    %21 = vector.extract_strided_slice %11 {offsets = [1, 0], sizes = [1, 256], strides = [1, 1]} : vector<4x256xf32> to vector<1x256xf32>
    %22 = vector.broadcast %21 : vector<1x256xf32> to vector<4x256xf32>
    %23 = arith.mulf %20, %22 : vector<4x256xf32>
    %24 = arith.addf %18, %23 : vector<4x256xf32>
    %c2 = arith.constant 2 : index
    %c0_19 = arith.constant 0 : index
    %c0_20 = arith.constant 0 : index
    %25 = vector.load %arg5[%c2, %c0_19, %c0_20] : memref<4x4x256xf32, #tpu.memory_space<vmem>>, vector<1x4x256xf32>
    %26 = vector.shape_cast %25 : vector<1x4x256xf32> to vector<4x256xf32>
    %27 = vector.extract_strided_slice %11 {offsets = [2, 0], sizes = [1, 256], strides = [1, 1]} : vector<4x256xf32> to vector<1x256xf32>
    %28 = vector.broadcast %27 : vector<1x256xf32> to vector<4x256xf32>
    %29 = arith.mulf %26, %28 : vector<4x256xf32>
    %30 = arith.addf %24, %29 : vector<4x256xf32>
    %c3 = arith.constant 3 : index
    %c0_21 = arith.constant 0 : index
    %c0_22 = arith.constant 0 : index
    %31 = vector.load %arg5[%c3, %c0_21, %c0_22] : memref<4x4x256xf32, #tpu.memory_space<vmem>>, vector<1x4x256xf32>
    %32 = vector.shape_cast %31 : vector<1x4x256xf32> to vector<4x256xf32>
    %33 = vector.extract_strided_slice %11 {offsets = [3, 0], sizes = [1, 256], strides = [1, 1]} : vector<4x256xf32> to vector<1x256xf32>
    %34 = vector.broadcast %33 : vector<1x256xf32> to vector<4x256xf32>
    %35 = arith.mulf %32, %34 : vector<4x256xf32>
    %36 = arith.addf %30, %35 : vector<4x256xf32>
    %37 = vector.broadcast %9 : vector<4x1xf32> to vector<4x256xf32>
    %38 = arith.addf %36, %37 : vector<4x256xf32>
    %cst_23 = arith.constant dense<0.000000e+00> : vector<4xf32>
    %39 = vector.multi_reduction <add>, %38, %cst_23 [1] : vector<4x256xf32> to vector<4xf32>
    %40 = vector.shape_cast %39 : vector<4xf32> to vector<4x1xf32>
    %cst_24 = arith.constant 2.560000e+02 : f32
    %41 = vector.broadcast %cst_24 : f32 to vector<4x1xf32>
    %42 = arith.divf %40, %41 : vector<4x1xf32>
    %43 = vector.broadcast %42 : vector<4x1xf32> to vector<4x256xf32>
    %44 = arith.subf %38, %43 : vector<4x256xf32>
    %45 = arith.mulf %44, %44 : vector<4x256xf32>
    %cst_25 = arith.constant dense<0.000000e+00> : vector<4xf32>
    %46 = vector.multi_reduction <add>, %45, %cst_25 [1] : vector<4x256xf32> to vector<4xf32>
    %47 = vector.shape_cast %46 : vector<4xf32> to vector<4x1xf32>
    %cst_26 = arith.constant 2.560000e+02 : f32
    %48 = vector.broadcast %cst_26 : f32 to vector<4x1xf32>
    %49 = arith.divf %47, %48 : vector<4x1xf32>
    %cst_27 = arith.constant 9.99999974E-6 : f32
    %50 = vector.broadcast %cst_27 : f32 to vector<4x1xf32>
    %51 = arith.addf %49, %50 : vector<4x1xf32>
    %52 = math.rsqrt %51 : vector<4x1xf32>
    %53 = vector.broadcast %52 : vector<4x1xf32> to vector<4x256xf32>
    %54 = arith.mulf %44, %53 : vector<4x256xf32>
    %c17_i32 = arith.constant 17 : i32
    %55 = tpu.dynamic_rotate %54 by %c17_i32 dim 1 : vector<4x256xf32>, i32 -> vector<4x256xf32>
    %c0_28 = arith.constant 0 : index
    %c0_29 = arith.constant 0 : index
    %c0_30 = arith.constant 0 : index
    %56 = vector.load %arg6[%c0_28, %c0_29, %c0_30] : memref<9x1x256xf32, #tpu.memory_space<vmem>>, vector<1x1x256xf32>
    %57 = vector.shape_cast %56 : vector<1x1x256xf32> to vector<1x256xf32>
    %58 = vector.broadcast %57 : vector<1x256xf32> to vector<4x256xf32>
    %59 = arith.mulf %55, %58 : vector<4x256xf32>
    %c16_i32 = arith.constant 16 : i32
    %60 = tpu.dynamic_rotate %54 by %c16_i32 dim 1 : vector<4x256xf32>, i32 -> vector<4x256xf32>
    %c1_31 = arith.constant 1 : index
    %c0_32 = arith.constant 0 : index
    %c0_33 = arith.constant 0 : index
    %61 = vector.load %arg6[%c1_31, %c0_32, %c0_33] : memref<9x1x256xf32, #tpu.memory_space<vmem>>, vector<1x1x256xf32>
    %62 = vector.shape_cast %61 : vector<1x1x256xf32> to vector<1x256xf32>
    %63 = vector.broadcast %62 : vector<1x256xf32> to vector<4x256xf32>
    %64 = arith.mulf %60, %63 : vector<4x256xf32>
    %c15_i32 = arith.constant 15 : i32
    %65 = tpu.dynamic_rotate %54 by %c15_i32 dim 1 : vector<4x256xf32>, i32 -> vector<4x256xf32>
    %c2_34 = arith.constant 2 : index
    %c0_35 = arith.constant 0 : index
    %c0_36 = arith.constant 0 : index
    %66 = vector.load %arg6[%c2_34, %c0_35, %c0_36] : memref<9x1x256xf32, #tpu.memory_space<vmem>>, vector<1x1x256xf32>
    %67 = vector.shape_cast %66 : vector<1x1x256xf32> to vector<1x256xf32>
    %68 = vector.broadcast %67 : vector<1x256xf32> to vector<4x256xf32>
    %69 = arith.mulf %65, %68 : vector<4x256xf32>
    %c1_i32 = arith.constant 1 : i32
    %70 = tpu.dynamic_rotate %54 by %c1_i32 dim 1 : vector<4x256xf32>, i32 -> vector<4x256xf32>
    %c3_37 = arith.constant 3 : index
    %c0_38 = arith.constant 0 : index
    %c0_39 = arith.constant 0 : index
    %71 = vector.load %arg6[%c3_37, %c0_38, %c0_39] : memref<9x1x256xf32, #tpu.memory_space<vmem>>, vector<1x1x256xf32>
    %72 = vector.shape_cast %71 : vector<1x1x256xf32> to vector<1x256xf32>
    %73 = vector.broadcast %72 : vector<1x256xf32> to vector<4x256xf32>
    %74 = arith.mulf %70, %73 : vector<4x256xf32>
    %c255_i32 = arith.constant 255 : i32
    %75 = tpu.dynamic_rotate %54 by %c255_i32 dim 1 : vector<4x256xf32>, i32 -> vector<4x256xf32>
    %c5 = arith.constant 5 : index
    %c0_40 = arith.constant 0 : index
    %c0_41 = arith.constant 0 : index
    %76 = vector.load %arg6[%c5, %c0_40, %c0_41] : memref<9x1x256xf32, #tpu.memory_space<vmem>>, vector<1x1x256xf32>
    %77 = vector.shape_cast %76 : vector<1x1x256xf32> to vector<1x256xf32>
    %78 = vector.broadcast %77 : vector<1x256xf32> to vector<4x256xf32>
    %79 = arith.mulf %75, %78 : vector<4x256xf32>
    %c241_i32 = arith.constant 241 : i32
    %80 = tpu.dynamic_rotate %54 by %c241_i32 dim 1 : vector<4x256xf32>, i32 -> vector<4x256xf32>
    %c6 = arith.constant 6 : index
    %c0_42 = arith.constant 0 : index
    %c0_43 = arith.constant 0 : index
    %81 = vector.load %arg6[%c6, %c0_42, %c0_43] : memref<9x1x256xf32, #tpu.memory_space<vmem>>, vector<1x1x256xf32>
    %82 = vector.shape_cast %81 : vector<1x1x256xf32> to vector<1x256xf32>
    %83 = vector.broadcast %82 : vector<1x256xf32> to vector<4x256xf32>
    %84 = arith.mulf %80, %83 : vector<4x256xf32>
    %c240_i32 = arith.constant 240 : i32
    %85 = tpu.dynamic_rotate %54 by %c240_i32 dim 1 : vector<4x256xf32>, i32 -> vector<4x256xf32>
    %c7 = arith.constant 7 : index
    %c0_44 = arith.constant 0 : index
    %c0_45 = arith.constant 0 : index
    %86 = vector.load %arg6[%c7, %c0_44, %c0_45] : memref<9x1x256xf32, #tpu.memory_space<vmem>>, vector<1x1x256xf32>
    %87 = vector.shape_cast %86 : vector<1x1x256xf32> to vector<1x256xf32>
    %88 = vector.broadcast %87 : vector<1x256xf32> to vector<4x256xf32>
    %89 = arith.mulf %85, %88 : vector<4x256xf32>
    %c239_i32 = arith.constant 239 : i32
    %90 = tpu.dynamic_rotate %54 by %c239_i32 dim 1 : vector<4x256xf32>, i32 -> vector<4x256xf32>
    %c8 = arith.constant 8 : index
    %c0_46 = arith.constant 0 : index
    %c0_47 = arith.constant 0 : index
    %91 = vector.load %arg6[%c8, %c0_46, %c0_47] : memref<9x1x256xf32, #tpu.memory_space<vmem>>, vector<1x1x256xf32>
    %92 = vector.shape_cast %91 : vector<1x1x256xf32> to vector<1x256xf32>
    %93 = vector.broadcast %92 : vector<1x256xf32> to vector<4x256xf32>
    %94 = arith.mulf %90, %93 : vector<4x256xf32>
    %95 = tpu.concatenate %59, %64, %69, %74, %54, %79, %84, %89, %94 in 0 : vector<4x256xf32>, vector<4x256xf32>, vector<4x256xf32>, vector<4x256xf32>, vector<4x256xf32>, vector<4x256xf32>, vector<4x256xf32>, vector<4x256xf32>, vector<4x256xf32> -> vector<36x256xf32>
    %cst_48 = arith.constant dense<0.000000e+00> : vector<8x256xf32>
    %96 = tpu.matmul %2, %95, %cst_48 {dimension_numbers = #tpu.dot_dimension_numbers<[1], [0], [0], [1], [0, 0, 1, 1], [], []>} : vector<8x36xf32>, vector<36x256xf32>, vector<8x256xf32> -> vector<8x256xf32>
    %97 = vector.broadcast %4 : vector<8x1xf32> to vector<8x256xf32>
    %98 = arith.addf %96, %97 : vector<8x256xf32>
    %cst_49 = arith.constant dense<0.000000e+00> : vector<8xf32>
    %99 = vector.multi_reduction <add>, %98, %cst_49 [1] : vector<8x256xf32> to vector<8xf32>
    %100 = vector.shape_cast %99 : vector<8xf32> to vector<8x1xf32>
    %cst_50 = arith.constant 2.560000e+02 : f32
    %101 = vector.broadcast %cst_50 : f32 to vector<8x1xf32>
    %102 = arith.divf %100, %101 : vector<8x1xf32>
    %103 = vector.broadcast %102 : vector<8x1xf32> to vector<8x256xf32>
    %104 = arith.subf %98, %103 : vector<8x256xf32>
    %105 = arith.mulf %104, %104 : vector<8x256xf32>
    %cst_51 = arith.constant dense<0.000000e+00> : vector<8xf32>
    %106 = vector.multi_reduction <add>, %105, %cst_51 [1] : vector<8x256xf32> to vector<8xf32>
    %107 = vector.shape_cast %106 : vector<8xf32> to vector<8x1xf32>
    %cst_52 = arith.constant 2.560000e+02 : f32
    %108 = vector.broadcast %cst_52 : f32 to vector<8x1xf32>
    %109 = arith.divf %107, %108 : vector<8x1xf32>
    %cst_53 = arith.constant 9.99999974E-6 : f32
    %110 = vector.broadcast %cst_53 : f32 to vector<8x1xf32>
    %111 = arith.addf %109, %110 : vector<8x1xf32>
    %112 = math.rsqrt %111 : vector<8x1xf32>
    %113 = vector.broadcast %112 : vector<8x1xf32> to vector<8x256xf32>
    %114 = arith.mulf %104, %113 : vector<8x256xf32>
    %c0_54 = arith.constant 0 : index
    %c0_55 = arith.constant 0 : index
    %c0_56 = arith.constant 0 : index
    %115 = vector.load %arg3[%c0_54, %c0_55, %c0_56] : memref<1x1x32xf32, #tpu.memory_space<vmem>>, vector<1x1x32xf32>
    %116 = vector.shape_cast %115 : vector<1x1x32xf32> to vector<1x32xf32>
    %117 = arith.negf %116 : vector<1x32xf32>
    %118 = math.exp %117 : vector<1x32xf32>
    %cst_57 = arith.constant 1.000000e+00 : f32
    %119 = vector.broadcast %cst_57 : f32 to vector<1x32xf32>
    %120 = arith.addf %119, %118 : vector<1x32xf32>
    %121 = arith.divf %119, %120 : vector<1x32xf32>
    %122 = arith.mulf %116, %121 : vector<1x32xf32>
    %123 = vector.broadcast %122 : vector<1x32xf32> to vector<8x32xf32>
    %124 = arith.mulf %3, %123 : vector<8x32xf32>
    %cst_58 = arith.constant dense<0.000000e+00> : vector<8xf32>
    %125 = vector.multi_reduction <add>, %124, %cst_58 [1] : vector<8x32xf32> to vector<8xf32>
    %126 = vector.shape_cast %125 : vector<8xf32> to vector<8x1xf32>
    %127 = arith.addf %126, %5 : vector<8x1xf32>
    %c0_59 = arith.constant 0 : index
    %c0_60 = arith.constant 0 : index
    %c0_61 = arith.constant 0 : index
    %128 = vector.load %arg2[%c0_59, %c0_60, %c0_61] : memref<1x8x256xf32, #tpu.memory_space<vmem>>, vector<1x8x256xf32>
    %129 = vector.shape_cast %128 : vector<1x8x256xf32> to vector<8x256xf32>
    %130 = arith.addf %114, %129 : vector<8x256xf32>
    %131 = vector.broadcast %127 : vector<8x1xf32> to vector<8x256xf32>
    %132 = arith.addf %130, %131 : vector<8x256xf32>
    %cst_62 = arith.constant dense<0.000000e+00> : vector<256xf32>
    %133 = vector.multi_reduction <add>, %132, %cst_62 [0] : vector<8x256xf32> to vector<256xf32>
    %134 = vector.shape_cast %133 : vector<256xf32> to vector<1x256xf32>
    %cst_63 = arith.constant 8.000000e+00 : f32
    %135 = vector.broadcast %cst_63 : f32 to vector<1x256xf32>
    %136 = arith.divf %134, %135 : vector<1x256xf32>
    %137 = vector.broadcast %136 : vector<1x256xf32> to vector<8x256xf32>
    %138 = arith.subf %132, %137 : vector<8x256xf32>
    %139 = arith.mulf %138, %138 : vector<8x256xf32>
    %cst_64 = arith.constant dense<0.000000e+00> : vector<256xf32>
    %140 = vector.multi_reduction <add>, %139, %cst_64 [0] : vector<8x256xf32> to vector<256xf32>
    %141 = vector.shape_cast %140 : vector<256xf32> to vector<1x256xf32>
    %cst_65 = arith.constant 8.000000e+00 : f32
    %142 = vector.broadcast %cst_65 : f32 to vector<1x256xf32>
    %143 = arith.divf %141, %142 : vector<1x256xf32>
    %144 = vector.broadcast %136 : vector<1x256xf32> to vector<8x256xf32>
    %145 = arith.subf %132, %144 : vector<8x256xf32>
    %cst_66 = arith.constant 9.99999974E-6 : f32
    %146 = vector.broadcast %cst_66 : f32 to vector<1x256xf32>
    %147 = arith.addf %143, %146 : vector<1x256xf32>
    %148 = math.rsqrt %147 : vector<1x256xf32>
    %149 = vector.broadcast %148 : vector<1x256xf32> to vector<8x256xf32>
    %150 = arith.mulf %145, %149 : vector<8x256xf32>
    %151 = vector.broadcast %6 : vector<8x1xf32> to vector<8x256xf32>
    %152 = arith.mulf %150, %151 : vector<8x256xf32>
    %153 = vector.broadcast %7 : vector<8x1xf32> to vector<8x256xf32>
    %154 = arith.addf %152, %153 : vector<8x256xf32>
    %cst_67 = arith.constant 0.000000e+00 : f32
    %155 = vector.broadcast %cst_67 : f32 to vector<8x256xf32>
    %c0_i32 = arith.constant 0 : i32
    %c4_i32 = arith.constant 4 : i32
    %156 = arith.addi %c0_i32, %c4_i32 : i32
    %c1_i32_68 = arith.constant 1 : i32
    %157 = scf.for %arg11 = %c0_i32 to %156 step %c1_i32_68 iter_args(%arg12 = %155) -> (vector<8x256xf32>)  : i32 {
      %166 = arith.index_cast %arg11 : i32 to index
      %c0_74 = arith.constant 0 : index
      %c0_75 = arith.constant 0 : index
      %167 = vector.load %arg8[%166, %c0_74, %c0_75] : memref<4x6x9xf32, #tpu.memory_space<vmem>>, vector<1x6x9xf32>
      %168 = vector.shape_cast %167 : vector<1x6x9xf32> to vector<6x9xf32>
      %169 = vector.extract_strided_slice %168 {offsets = [0, 0], sizes = [6, 8], strides = [1, 1]} : vector<6x9xf32> to vector<6x8xf32>
      %cst_76 = arith.constant dense<0.000000e+00> : vector<6x256xf32>
      %170 = tpu.matmul %169, %154, %cst_76 {dimension_numbers = #tpu.dot_dimension_numbers<[1], [0], [0], [1], [0, 0, 1, 1], [], []>} : vector<6x8xf32>, vector<8x256xf32>, vector<6x256xf32> -> vector<6x256xf32>
      %171 = vector.extract_strided_slice %168 {offsets = [0, 8], sizes = [6, 1], strides = [1, 1]} : vector<6x9xf32> to vector<6x1xf32>
      %172 = vector.broadcast %171 : vector<6x1xf32> to vector<6x256xf32>
      %173 = arith.addf %170, %172 : vector<6x256xf32>
      %174 = vector.extract_strided_slice %173 {offsets = [0, 0], sizes = [2, 256], strides = [1, 1]} : vector<6x256xf32> to vector<2x256xf32>
      %175 = arith.truncf %174 : vector<2x256xf32> to vector<2x256xbf16>
      %176 = vector.extract_strided_slice %173 {offsets = [2, 0], sizes = [2, 256], strides = [1, 1]} : vector<6x256xf32> to vector<2x256xf32>
      %177 = arith.truncf %176 : vector<2x256xf32> to vector<2x256xbf16>
      %178 = vector.extract_strided_slice %173 {offsets = [4, 0], sizes = [2, 256], strides = [1, 1]} : vector<6x256xf32> to vector<2x256xf32>
      %179 = arith.truncf %178 : vector<2x256xf32> to vector<2x256xbf16>
      %cst_77 = arith.constant dense<0.000000e+00> : vector<256x256xf32>
      %180 = tpu.matmul %175, %177, %cst_77 {dimension_numbers = #tpu.dot_dimension_numbers<[0], [0], [1], [1], [0, 1, 1, 1], [], []>} : vector<2x256xbf16>, vector<2x256xbf16>, vector<256x256xf32> -> vector<256x256xf32>
      %cst_78 = arith.constant dense<0xFF800000> : vector<256xf32>
      %181 = vector.multi_reduction <maximumf>, %180, %cst_78 [1] : vector<256x256xf32> to vector<256xf32>
      %182 = vector.shape_cast %181 : vector<256xf32> to vector<256x1xf32>
      %183 = vector.broadcast %182 : vector<256x1xf32> to vector<256x256xf32>
      %184 = arith.subf %180, %183 : vector<256x256xf32>
      %185 = math.exp %184 : vector<256x256xf32>
      %cst_79 = arith.constant dense<0.000000e+00> : vector<256xf32>
      %186 = vector.multi_reduction <add>, %185, %cst_79 [1] : vector<256x256xf32> to vector<256xf32>
      %187 = vector.shape_cast %186 : vector<256xf32> to vector<256x1xf32>
      %188 = tpu.reciprocal %187 {approx = true} : vector<256x1xf32> -> vector<256x1xf32>
      %189 = vector.broadcast %188 : vector<256x1xf32> to vector<256x256xf32>
      %190 = arith.mulf %185, %189 : vector<256x256xf32>
      %191 = arith.truncf %190 : vector<256x256xf32> to vector<256x256xbf16>
      %cst_80 = arith.constant dense<0.000000e+00> : vector<2x256xf32>
      %192 = tpu.matmul %179, %191, %cst_80 {dimension_numbers = #tpu.dot_dimension_numbers<[1], [1], [0], [0], [0, 0, 1, 0], [], []>} : vector<2x256xbf16>, vector<256x256xbf16>, vector<2x256xf32> -> vector<2x256xf32>
      %193 = arith.index_cast %arg11 : i32 to index
      %c0_81 = arith.constant 0 : index
      %c0_82 = arith.constant 0 : index
      %194 = vector.load %arg9[%193, %c0_81, %c0_82] : memref<4x8x2xf32, #tpu.memory_space<vmem>>, vector<1x8x2xf32>
      %195 = vector.shape_cast %194 : vector<1x8x2xf32> to vector<8x2xf32>
      %cst_83 = arith.constant dense<0.000000e+00> : vector<8x256xf32>
      %196 = tpu.matmul %195, %192, %cst_83 {dimension_numbers = #tpu.dot_dimension_numbers<[1], [0], [0], [1], [0, 0, 1, 1], [], []>} : vector<8x2xf32>, vector<2x256xf32>, vector<8x256xf32> -> vector<8x256xf32>
      %197 = arith.addf %arg12, %196 : vector<8x256xf32>
      scf.yield %197 : vector<8x256xf32>
    }
    %c4_i32_69 = arith.constant 4 : i32
    %158 = vector.broadcast %8 : vector<8x1xf32> to vector<8x256xf32>
    %159 = arith.addf %157, %158 : vector<8x256xf32>
    %160 = arith.addf %159, %132 : vector<8x256xf32>
    %cst_70 = arith.constant 0.000000e+00 : f32
    %161 = vector.broadcast %cst_70 : f32 to vector<8x256xf32>
    %162 = arith.maximumf %160, %161 : vector<8x256xf32>
    %c0_71 = arith.constant 0 : index
    %c0_72 = arith.constant 0 : index
    %c0_73 = arith.constant 0 : index
    %163 = vector.load %arg10[%c0_71, %c0_72, %c0_73] : memref<1x8x256xf32, #tpu.memory_space<vmem>>, vector<1x8x256xf32>
    %164 = vector.shape_cast %163 : vector<1x8x256xf32> to vector<8x256xf32>
    %165 = vector.shape_cast %162 : vector<8x256xf32> to vector<1x8x256xf32>
    tpu.vector_store %arg10[%c0_71, %c0_72, %c0_73], %165 {strides = array<i32>} : memref<1x8x256xf32, #tpu.memory_space<vmem>>, vector<1x8x256xf32>,
    return
  }
  func.func @transform_0(%arg0: i32) -> (i32, i32, i32) {
    %c0_i32 = arith.constant 0 : i32
    %c0_i32_0 = arith.constant 0 : i32
    %c0_i32_1 = arith.constant 0 : i32
    return %arg0, %c0_i32, %c0_i32_0 : i32, i32, i32
  }
  func.func @transform_1(%arg0: i32) -> (i32, i32, i32) {
    %c0_i32 = arith.constant 0 : i32
    %c0_i32_0 = arith.constant 0 : i32
    %c0_i32_1 = arith.constant 0 : i32
    return %arg0, %c0_i32, %c0_i32_0 : i32, i32, i32
  }
  func.func @transform_2(%arg0: i32) -> (i32, i32, i32) {
    %c0_i32 = arith.constant 0 : i32
    %c0_i32_0 = arith.constant 0 : i32
    %c0_i32_1 = arith.constant 0 : i32
    return %arg0, %c0_i32, %c0_i32_0 : i32, i32, i32
  }
  func.func @transform_3(%arg0: i32) -> (i32, i32) {
    %c0_i32 = arith.constant 0 : i32
    %c0_i32_0 = arith.constant 0 : i32
    %c0_i32_1 = arith.constant 0 : i32
    return %c0_i32, %c0_i32_0 : i32, i32
  }
  func.func @transform_4(%arg0: i32) -> (i32, i32, i32) {
    %c0_i32 = arith.constant 0 : i32
    %c0_i32_0 = arith.constant 0 : i32
    %c0_i32_1 = arith.constant 0 : i32
    %c0_i32_2 = arith.constant 0 : i32
    return %c0_i32, %c0_i32_0, %c0_i32_1 : i32, i32, i32
  }
  func.func @transform_5(%arg0: i32) -> (i32, i32, i32) {
    %c0_i32 = arith.constant 0 : i32
    %c0_i32_0 = arith.constant 0 : i32
    %c0_i32_1 = arith.constant 0 : i32
    %c0_i32_2 = arith.constant 0 : i32
    return %c0_i32, %c0_i32_0, %c0_i32_1 : i32, i32, i32
  }
  func.func @transform_6(%arg0: i32) -> (i32, i32) {
    %c0_i32 = arith.constant 0 : i32
    %c0_i32_0 = arith.constant 0 : i32
    %c0_i32_1 = arith.constant 0 : i32
    return %c0_i32, %c0_i32_0 : i32, i32
  }
  func.func @transform_7(%arg0: i32) -> (i32, i32, i32) {
    %c0_i32 = arith.constant 0 : i32
    %c0_i32_0 = arith.constant 0 : i32
    %c0_i32_1 = arith.constant 0 : i32
    %c0_i32_2 = arith.constant 0 : i32
    return %c0_i32, %c0_i32_0, %c0_i32_1 : i32, i32, i32
  }
  func.func @transform_8(%arg0: i32) -> (i32, i32, i32) {
    %c0_i32 = arith.constant 0 : i32
    %c0_i32_0 = arith.constant 0 : i32
    %c0_i32_1 = arith.constant 0 : i32
    %c0_i32_2 = arith.constant 0 : i32
    return %c0_i32, %c0_i32_0, %c0_i32_1 : i32, i32, i32
  }
  func.func @transform_9(%arg0: i32) -> (i32, i32, i32) {
    %c0_i32 = arith.constant 0 : i32
    %c0_i32_0 = arith.constant 0 : i32
    %c0_i32_1 = arith.constant 0 : i32
    return %arg0, %c0_i32, %c0_i32_0 : i32, i32, i32
  }
}

</mosaic_0001>

<bundles_post_ra>
// kernel: decoder_block_forward.1
= control target key start
LH: loop header
LB: loop body
LE: loop exit
PB: predicated region body
PF: predicated region fallthrough
CT: control target
= control target key end

     0   :  { %s2544_s30 = smov 0   ;;  %s3413_s0 = inlined_call_operand.vmem [shape: f32[2,4,64], index: 0, kind: input, shape index: {}]   ;;  %s3414_s1 = inlined_call_operand.vmem [shape: f32[2,8,256], index: 1, kind: input, shape index: {}]   ;;  %s3415_s2 = inlined_call_operand.vmem [shape: f32[2,1,32], index: 2, kind: input, shape index: {}]   ;;  %s3416_s3 = inlined_call_operand.vmem [shape: f32[64,256], index: 3, kind: input, shape index: {}]   ;;  %s3417_s4 = inlined_call_operand.vmem [shape: f32[4,4,256], index: 4, kind: input, shape index: {}]   ;;  %s3418_s5 = inlined_call_operand.vmem [shape: f32[9,1,256], index: 5, kind: input, shape index: {}]   ;;  %s3419_s6 = inlined_call_operand.vmem [shape: f32[8,128], index: 6, kind: input, shape index: {}]   ;;  %s3420_s7 = inlined_call_operand.vmem [shape: f32[4,6,9], index: 7, kind: input, shape index: {}]   ;;  %s3421_s8 = inlined_call_operand.vmem [shape: f32[4,8,2], index: 8, kind: input, shape index: {}]   ;;  %s3422_s9 = inlined_call_operand.vmem [shape: f32[2,8,256], index: 9, kind: output, shape index: {}]  }
   0x1 LB: > { %s2101_s10 = sadd.s32 4294967295, %s2459_s30   ;;  %p2105_p0 = scmp.ge.s32.totalorder %s2459_s30, 1  ;;  %s2459_s30 = sphi %s2544_s30, %s19_s30  }
   0x2   : > { %p304_p1 = scmp.lt.s32.totalorder %s2459_s30, 3 }
   0x4   : > { %p305_p2 = pnand %p2105_p0, %p304_p1 }
   0x6   : > { %308 = sbr.rel (%p305_p2) target bundleno = 2827 (0xb0b), region = 56 }
   0xd   : > { %v369_v0 = vld [vmem:[%s3416_s3 + $0x8] sm:$0xff]  ;;  %v371_v1 = vld [vmem:[%s3416_s3 + $0x18] sm:$0xff]  ;;  %v368_v2 = vld [vmem:[%s3416_s3] sm:$0xff]  ;;  %v2473_v7 = vmov 0.0   ;;  %p2581_p3 = scmp.lt.s32.totalorder %s2101_s10, 1  ;;  %v2474_v13 = vmov 73   ;;  %v460_v28 = vlaneseq }
   0xe   : > { %v2152_v3 = vpack.c.bf16 %v371_v1, %v369_v0  ;;  %v370_v4 = vld [vmem:[%s3416_s3 + $0x10] sm:$0xff]  ;;  %v373_v5 = vld [vmem:[%s3416_s3 + $0x28] sm:$0xff]  ;;  %v375_v6 = vld [vmem:[%s3416_s3 + $0x38] sm:$0xff]  ;;  %452 = vmatprep.mubr.f32.mxu0 %v2473_v7  ;;  %868 = vmatprep.mubr.f32.mxu1 %v2473_v7  ;;  %vm384_vm0 = vcmask 523264   ;;  %v2475_v30 = vmov 839922192  }
   0xf   : > { %v2154_v8 = vpack.c.bf16 %v370_v4, %v368_v2  ;;  %v2156_v9 = vpack.c.bf16 %v375_v6, %v373_v5  ;;  %v372_v10 = vld [vmem:[%s3416_s3 + $0x20] sm:$0xff]  ;;  %v374_v11 = vld [vmem:[%s3416_s3 + $0x30] sm:$0xff]  ;;  %v377_v12 = vld [vmem:[%s3416_s3 + $0x48] sm:$0xff]  ;;  %2229 = vset.pattern.permute.xlu0 %v2474_v13  ;;  %s3536_s10 = smov (!%p2581_p3, %s2101_s10), 1  ;;  %v461_v29 = vshrl.u32 %v460_v28, 7  ;;  %v527_v31 = vunpack.c.l.s4 %v2475_v30  ;;  %s2476_s20 = smov 16  }
  0x10   : > { %2153 = vmatprep.subr.bf16.mxu0 %v2152_v3  ;;  %v379_v14 = vld [vmem:[%s3416_s3 + $0x58] sm:$0xff]  ;;  %v2158_v15 = vpack.c.bf16 %v374_v11, %v372_v10  ;;  %v376_v17 = vld [vmem:[%s3416_s3 + $0x40] sm:$0xff]  ;;  %v378_v18 = vld [vmem:[%s3416_s3 + $0x50] sm:$0xff]  ;;  %s2106_s27 = sshll.u32 %s3536_s10, 2  ;;  %vm538_vm1 = vcmask 1043456   ;;  %s2477_s21 = smov 17  }
  0x11   : > { %2155 = vmatpush1.bf16.msra.mxu0 %v2154_v8  ;;  %v2160_v16 = vpack.c.bf16 %v379_v14, %v377_v12  ;;  %v367_v19 = vld [vmem:[%s3419_s6] sm:$0xf]  ;;  %v381_v20 = vld [vmem:[%s3416_s3 + $0x68] sm:$0xff]  ;;  %v383_v21 = vld [vmem:[%s3416_s3 + $0x78] sm:$0xff]  ;;  %v2162_v22 = vpack.c.bf16 %v378_v18, %v376_v17  ;;  %s350_s11 = scalar_lea.vmem %s3413_s0, %s2106_s27  ;;  %v2620_v32 = vsub.s32 0, %v461_v29  ;;  %v2622_v33 = vsub.s32 1, %v461_v29 }
  0x12   : > { %2157 = vmatprep.subr.bf16.mxu0 %v2156_v9  ;;  %524 = vperm.xlu0 %2229, %v367_v19   ;;  %v2164_v23 = vpack.c.bf16 %v383_v21, %v381_v20  ;;  %v380_v24 = vld [vmem:[%s3416_s3 + $0x60] sm:$0xff]  ;;  %v382_v25 = vld [vmem:[%s3416_s3 + $0x70] sm:$0xff]  ;;  %v494_v34 = vsub.s32 2, %v461_v29  ;;  %v510_v35 = vsub.s32 3, %v461_v29  ;;  %v528_v37 = vunpack.c.0.s8 %v527_v31  ;;  %v2112_v48 = vld [vmem:[%s3417_s4 + $0x8] sm:$0xff]  ;;  %s2478_s22 = smov 1  }
  0x13   : > { %v2166_v26 = vpack.c.bf16 %v382_v25, %v380_v24  ;;  %v365_v27 = vld [vmem:[%s350_s11] sm:$0xf]  ;;  %v2113_v53 = vld [vmem:[%s3417_s4 + $0x10] sm:$0xff]  ;;  %v2114_v57 = vld [vmem:[%s3417_s4 + $0x18] sm:$0xff]  ;;  %s2479_s23 = smov 112   ;;  %s2480_s24 = smov 113  }
  0x14   : > { %v459_v47 = vld [vmem:[%s3417_s4] sm:$0xff]  ;;  %v531_v56 = vsub.s32 %v528_v37, %v461_v29  ;;  %s2481_s25 = smov 15   ;;  %s2482_s26 = smov 111   ;;  %v2484_v25 = vmov 68   ;;  %vm795_vm10 = vcmask 293888   ;;  %vm912_vm11 = vcmask 261120  }
  0x15   : > { %2159 = vmatpush1.bf16.msra.mxu0 %v2158_v15  ;;  %s2483_s27 = smov 127   ;;  %s358_s11 = scalar_lea.vmem %s3415_s2, %s3536_s10  ;;  %v2672_v24 = vld [vmem:[%s3419_s6] sm:$0xff] }
  0x16   : > { %2161 = vmatprep.subr.bf16.mxu0 %v2160_v16  ;;  %3455 = vst [vmem:[#allocation2_spill] sm:$0xff] %v2672_v24  ;;  %2230 = vset.pattern.permute.xlu0 %v2484_v25  ;;  %s2485_s14 = smov 36   ;;  %s2486_s12 = smov 92  }
  0x17   : > { %s2150_s13 = sshll.u32 %s3536_s10, 4  ;;  %s2796_s10 = smov 0  }
  0x18   : > { %s2772_s16 = scalar_lea.vmem %s3422_s9, %s2150_s13  ;;  %s355_s19 = scalar_lea.vmem %s3414_s1, %s2150_s13 }
  0x19   : > { %2163 = vmatpush1.bf16.msra.mxu0 %v2162_v22  ;;  %v891_v22 = vld [vmem:[%s358_s11] sm:$0x1] }
  0x1a   : > { %2165 = vmatprep.subr.bf16.mxu0 %v2164_v23  ;;  %v2125_v23 = vmul.f32 -1.442695, %v891_v22 }
  0x1d   : > { %2167 = vmatpush1.bf16.msra.mxu0 %v2166_v26 }
  0x20   : > { %2111 = vmatmul.mubr.msk.f32.vlgmr.msra.gmra.mrb[0].mxu0 %vm384_vm0, %v365_v27 }
  0x91   : > { %v525_v58 = vpop.permute.xlu0 %524 }
  0x92   : > { %v532_v63 = vrot.slane %v525_v58, %v531_v56  ;;  %v2118_v58 = vld [vmem:[%s3418_s5 + $0xa] sm:$0x3] }
  0xf3   : > { %v454_v36 = vpop.f32.mrb[0].mxu0 }
  0xf4   : > { %v463_v38 = vrot.slane %v454_v36, %v2620_v32  ;;  %v479_v39 = vrot.slane %v454_v36, %v2622_v33  ;;  %v456_v40 = vpop.f32.mrb[1].mxu0  ;;  %v495_v41 = vrot.slane %v454_v36, %v494_v34  ;;  %v511_v42 = vrot.slane %v454_v36, %v510_v35 }
  0xf5   : > { %v467_v43 = vrot.slane %v456_v40, %v2620_v32  ;;  %v483_v44 = vrot.slane %v456_v40, %v2622_v33  ;;  %v499_v45 = vrot.slane %v456_v40, %v494_v34  ;;  %v515_v46 = vrot.slane %v456_v40, %v510_v35 }
  0xf7   : > { %v470_v49 = vcombine.low %v463_v38, %v467_v43  ;;  %v486_v50 = vcombine.low %v479_v39, %v483_v44  ;;  %v502_v51 = vcombine.low %v495_v41, %v499_v45  ;;  %v518_v52 = vcombine.low %v511_v42, %v515_v46  ;;  %v2115_v41 = vld [vmem:[%s3418_s5 + $0x2] sm:$0x3]  ;;  %v2117_v42 = vld [vmem:[%s3418_s5 + $0x6] sm:$0x3]  ;;  %v590_v43 = vld [vmem:[%s3418_s5] sm:$0x3] }
  0xf8   : > { %v2680_v39 = vand.u32 127, %v460_v28  ;;  %v617_v44 = vrot.slane %v2115_v41, %v2620_v32  ;;  %v621_v28 = vrot.slane %v2115_v41, %v2622_v33 }
  0xf9   : > { %v472_v54 = vmul.f32 %v470_v49, %v459_v47  ;;  %v488_v55 = vmul.f32 %v2112_v48, %v486_v50  ;;  %v504_v59 = vmul.f32 %v2113_v53, %v502_v51  ;;  %v520_v62 = vmul.f32 %v2114_v57, %v518_v52  ;;  %v2116_v51 = vld [vmem:[%s3418_s5 + $0x4] sm:$0x3] }
  0xfa   : > { %vm608_vm2 = vcmp.lt.s32.totalorder %v2680_v39, 16  ;;  %vm652_vm3 = vcmp.lt.s32.totalorder %v2680_v39, 1  ;;  %v661_v49 = vrot.slane %v2117_v42, %v2620_v32  ;;  %v665_v50 = vrot.slane %v2117_v42, %v2622_v33 }
  0xfb   : > { %v489_v60 = vadd.f32 %v488_v55, %v472_v54  ;;  %vm587_vm4 = vcmp.lt.s32.totalorder %v2680_v39, 17  ;;  %v595_v52 = vrot.slane %v590_v43, %v2620_v32  ;;  %v599_v53 = vrot.slane %v590_v43, %v2622_v33  ;;  %v2120_v54 = vld [vmem:[%s3418_s5 + $0xe] sm:$0x3] }
  0xfc   : > { %vm718_vm5 = vcmp.lt.s32.totalorder %v2680_v39, 112  ;;  %vm630_vm6 = vcmp.lt.s32.totalorder %v2680_v39, 15  ;;  %vm674_vm7 = vcmp.lt.s32.totalorder %v2680_v39, 127  ;;  %vm696_vm8 = vcmp.lt.s32.totalorder %v2680_v39, 113 }
  0xfd   : > { %v505_v61 = vadd.f32 %v504_v59, %v489_v60  ;;  %vm740_vm9 = vcmp.lt.s32.totalorder %v2680_v39, 111 }
  0xff   : > { %v521_v0 = vadd.f32 %v520_v62, %v505_v61  ;;  %v639_v61 = vrot.slane %v2116_v51, %v2620_v32  ;;  %v643_v62 = vrot.slane %v2116_v51, %v2622_v33 }
 0x101   : > { %v534_v1 = vadd.f32 %v532_v63, %v521_v0 }
 0x103   : > { %v536_v2 = vcombine.high %v534_v1, %v534_v1  ;;  %v539_v3 = vsel %vm538_vm1, %v534_v1, 0.0 }
 0x105   : > { %v540_v4 = vsel %vm538_vm1, %v536_v2, 0.0 }
 0x106   : > { %v541_v5 = vadd.f32 %v540_v4, %v539_v3  ;;  %v727_v3 = vrot.slane %v2120_v54, %v2620_v32  ;;  %v731_v4 = vrot.slane %v2120_v54, %v2622_v33 }
 0x108   : > { %542 = vadd.xlane.f32.xlu0 %v541_v5  ;;  %v683_v5 = vrot.slane %v2118_v58, %v2620_v32 }
 0x195   : > { %v543_v6 = vpop.xlane.xlu0 %542 }
 0x196   : > { %v545_v7 = vmul.f32 0.00390625, %v543_v6 }
 0x198   : > { %v553_v8 = vrot.slane %v545_v7, %v531_v56 }
 0x19a   : > { %v555_v9 = vsub.f32 %v534_v1, %v553_v8 }
 0x19c   : > { %v556_v10 = vmul.f32 %v555_v9, %v555_v9 }
 0x19e   : > { %v558_v11 = vcombine.high %v556_v10, %v556_v10  ;;  %v560_v12 = vsel %vm538_vm1, %v556_v10, 0.0  ;;  %v687_v10 = vrot.slane %v2118_v58, %v2622_v33 }
 0x1a0   : > { %v561_v13 = vsel %vm538_vm1, %v558_v11, 0.0  ;;  %v2119_v11 = vld [vmem:[%s3418_s5 + $0xc] sm:$0x3] }
 0x1a1   : > { %v562_v14 = vadd.f32 %v561_v13, %v560_v12  ;;  %v705_v25 = vrot.slane %v2119_v11, %v2620_v32 }
 0x1a3   : > { %563 = vadd.xlane.f32.xlu1 %v562_v14 }
 0x230   : > { %v564_v15 = vpop.xlane.xlu1 %563 }
 0x231   : > { %v565_v16 = vmul.f32 0.00390625, %v564_v15 }
 0x233   : > { %v566_v17 = vadd.f32 1e-05, %v565_v16 }
 0x235   : > { %2235 = vrsqrt.f32 %v566_v17 }
 0x236   : > { %2237 = vpow2.f32 %v2125_v23 }
 0x23f   : > { %v2236_v18 = vpop.eup %2235 }
 0x240   : > { %v575_v19 = vrot.slane %v2236_v18, %v531_v56  ;;  %v2238_v26 = vpop.eup %2237 }
 0x241   : > { %v895_v27 = vadd.f32 1.0, %v2238_v26  ;;  %v709_v26 = vrot.slane %v2119_v11, %v2622_v33 }
 0x242   : > { %v2644_v20 = vmul.f32 %v575_v19, %v555_v9 }
 0x243   : > { %2239 = vrcp.f32 %v895_v27 }
 0x244   : > { %604 = vrot.lane.b32.xlu1 %v2644_v20, %s2476_s20  ;;  %v2649_v21 = vcombine.high %v2644_v20, %v2644_v20 }
 0x246   : > { %583 = vrot.lane.b32.xlu0 %v2649_v21, %s2477_s21 }
 0x248   : > { %648 = vrot.lane.b32.xlu1 %v2644_v20, %s2478_s22 }
 0x24a   : > { %716 = vrot.lane.b32.xlu0 %v2649_v21, %s2479_s23 }
 0x24c   : > { %581 = vrot.lane.b32.xlu1 %v2644_v20, %s2477_s21 }
 0x24d   : > { %v2240_v29 = vpop.eup %2239 }
 0x24e   : > { %694 = vrot.lane.b32.xlu0 %v2649_v21, %s2480_s24  ;;  %v898_v30 = vmul.f32 %v2240_v29, %v891_v22 }
 0x250   : > { %626 = vrot.lane.b32.xlu1 %v2644_v20, %s2481_s25  ;;  %v903_v31 = vrot.slane %v898_v30, %v2620_v32 }
 0x252   : > { %738 = vrot.lane.b32.xlu0 %v2649_v21, %s2482_s26 }
 0x254   : > { %670 = vrot.lane.b32.xlu1 %v2644_v20, %s2483_s27 }
 0x256   : > { %792 = vperm.xlu0 %2230, %v2672_v24  }
 0x258   : > { %714 = vrot.lane.b32.xlu1 %v2644_v20, %s2479_s23 }
 0x25c   : > { %606 = vrot.lane.b32.xlu1 %v2649_v21, %s2476_s20 }
 0x260   : > { %650 = vrot.lane.b32.xlu1 %v2649_v21, %s2478_s22 }
 0x264   : > { %628 = vrot.lane.b32.xlu1 %v2649_v21, %s2481_s25 }
 0x268   : > { %672 = vrot.lane.b32.xlu1 %v2649_v21, %s2483_s27 }
 0x26c   : > { %692 = vrot.lane.b32.xlu1 %v2644_v20, %s2480_s24 }
 0x270   : > { %736 = vrot.lane.b32.xlu1 %v2644_v20, %s2482_s26 }
 0x274   : > { %904 = vrot.lane.b32.xlu1 %v903_v31, %s2485_s14 }
 0x2b6   : > { %v605_v34 = vpop.permute.xlu1 %604 }
 0x2b8   : > { %v584_v48 = vpop.permute.xlu0 %583 }
 0x2ba   : > { %v649_v35 = vpop.permute.xlu1 %648 }
 0x2bc   : > { %v717_v6 = vpop.permute.xlu0 %716 }
 0x2be   : > { %v582_v36 = vpop.permute.xlu1 %581 }
 0x2bf   : > { %v588_v63 = vsel %vm587_vm4, %v582_v36, %v584_v48  ;;  %v589_v0 = vsel %vm587_vm4, %v584_v48, %v582_v36 }
 0x2c0   : > { %v602_v12 = vmul.f32 %v595_v52, %v589_v0  ;;  %v603_v13 = vmul.f32 %v599_v53, %v588_v63  ;;  %v695_v41 = vpop.permute.xlu0 %694 }
 0x2c2   : > { %v627_v37 = vpop.permute.xlu1 %626 }
 0x2c6   : > { %v2677_v38 = vpop.permute.xlu1 %670 }
 0x2ca   : > { %v715_v40 = vpop.permute.xlu1 %714 }
 0x2cb   : > { %v719_v22 = vsel %vm718_vm5, %v715_v40, %v717_v6  ;;  %v720_v23 = vsel %vm718_vm5, %v717_v6, %v715_v40 }
 0x2cc   : > { %v734_v42 = vmul.f32 %v727_v3, %v719_v22  ;;  %v735_v43 = vmul.f32 %v731_v4, %v720_v23 }
 0x2ce   : > { %v607_v45 = vpop.permute.xlu1 %606  ;;  %v778_v51 = vrot.slane %v734_v42, 4  ;;  %v779_v52 = vrot.slane %v735_v43, 4 }
 0x2cf   : > { %v609_v46 = vsel %vm608_vm2, %v605_v34, %v607_v45  ;;  %v610_v47 = vsel %vm608_vm2, %v607_v45, %v605_v34  ;;  %v2121_v45 = vld [vmem:[%s3418_s5 + $0x10] sm:$0x3] }
 0x2d0   : > { %v624_v55 = vmul.f32 %v617_v44, %v610_v47  ;;  %v625_v56 = vmul.f32 %v621_v28, %v609_v46  ;;  %v749_v63 = vrot.slane %v2121_v45, %v2620_v32 }
 0x2d2   : > { %v651_v57 = vpop.permute.xlu1 %650  ;;  %v760_v7 = vrot.slane %v624_v55, 4  ;;  %v761_v8 = vrot.slane %v625_v56, 4  ;;  %v739_v55 = vpop.permute.xlu0 %738 }
 0x2d3   : > { %v653_v59 = vsel %vm652_vm3, %v649_v35, %v651_v57  ;;  %v654_v60 = vsel %vm652_vm3, %v651_v57, %v649_v35 }
 0x2d4   : > { %v668_v1 = vmul.f32 %v661_v49, %v654_v60  ;;  %v669_v2 = vmul.f32 %v665_v50, %v653_v59  ;;  %v783_v29 = vsel %vm538_vm1, %v603_v13, %v761_v8  ;;  %v782_v31 = vsel %vm538_vm1, %v602_v12, %v760_v7 }
 0x2d5   : > { %v753_v50 = vrot.slane %v2121_v45, %v2622_v33  ;;  %v2489_v13 = vmov 71  }
 0x2d6   : > { %v629_v9 = vpop.permute.xlu1 %628  ;;  %v766_v16 = vrot.slane %v668_v1, 4  ;;  %v767_v17 = vrot.slane %v669_v2, 4  ;;  %v793_v39 = vpop.permute.xlu0 %792 }
 0x2d7   : > { %v631_v14 = vsel %vm630_vm6, %v627_v37, %v629_v9  ;;  %v632_v15 = vsel %vm630_vm6, %v629_v9, %v627_v37  ;;  %v2487_v9 = vmov 69  }
 0x2d8   : > { %v646_v18 = vmul.f32 %v639_v61, %v632_v15  ;;  %v647_v19 = vmul.f32 %v643_v62, %v631_v14  ;;  %2231 = vset.pattern.permute.xlu1 %v2487_v9 }
 0x2da   : > { %v673_v27 = vpop.permute.xlu1 %672  ;;  %v785_v30 = vsel %vm538_vm1, %v647_v19, %v767_v17  ;;  %v784_v34 = vsel %vm538_vm1, %v646_v18, %v766_v16 }
 0x2db   : > { %v675_v35 = vsel %vm674_vm7, %v2677_v38, %v673_v27  ;;  %v676_v36 = vsel %vm674_vm7, %v673_v27, %v2677_v38  ;;  %v2168_v37 = vpack.c.bf16 %v785_v30, %v783_v29  ;;  %v2170_v40 = vpack.c.bf16 %v784_v34, %v782_v31  ;;  %v917_v29 = vld [vmem:[%s355_s19] sm:$0xff]  ;;  %v918_v30 = vld [vmem:[%s355_s19 + $0x8] sm:$0xff] }
 0x2dc   : > { %v690_v44 = vmul.f32 %v683_v5, %v675_v35  ;;  %v691_v28 = vmul.f32 %v687_v10, %v676_v36  ;;  %v2488_v10 = vmov 70  }
 0x2dd   : > { %2169 = vmatprep.subr.bf16.mxu1 %v2168_v37  ;;  %2232 = vset.pattern.permute.xlu0 %v2488_v10 }
 0x2de   : > { %v772_v46 = vrot.slane %v690_v44, 4  ;;  %v773_v47 = vrot.slane %v691_v28, 4  ;;  %2171 = vmatpush1.bf16.msra.mxu1 %v2170_v40  ;;  %v693_v48 = vpop.permute.xlu1 %692 }
 0x2df   : > { %v697_v49 = vsel %vm696_vm8, %v693_v48, %v695_v41  ;;  %v698_v38 = vsel %vm696_vm8, %v695_v41, %v693_v48 }
 0x2e0   : > { %v712_v53 = vmul.f32 %v705_v25, %v697_v49  ;;  %v713_v54 = vmul.f32 %v709_v26, %v698_v38  ;;  %v787_v57 = vsel %vm538_vm1, %v2649_v21, %v773_v47  ;;  %v786_v59 = vsel %vm538_vm1, %v2644_v20, %v772_v46 }
 0x2e2   : > { %v737_v56 = vpop.permute.xlu1 %736  ;;  %v789_v58 = vsel %vm538_vm1, %v713_v54, %v779_v52  ;;  %v788_v60 = vsel %vm538_vm1, %v712_v53, %v778_v51 }
 0x2e3   : > { %v742_v61 = vsel %vm740_vm9, %v739_v55, %v737_v56  ;;  %v2172_v33 = vpack.c.bf16 %v789_v58, %v787_v57  ;;  %v2174_v62 = vpack.c.bf16 %v788_v60, %v786_v59  ;;  %v741_v1 = vsel %vm740_vm9, %v737_v56, %v739_v55 }
 0x2e4   : > { %v757_v0 = vmul.f32 %v753_v50, %v742_v61  ;;  %v756_v21 = vmul.f32 %v749_v63, %v741_v1 }
 0x2e5   : > { %2173 = vmatprep.subr.bf16.mxu1 %v2172_v33 }
 0x2e6   : > { %2175 = vmatpush1.bf16.msra.mxu1 %v2174_v62  ;;  %v905_v20 = vpop.permute.xlu1 %904 }
 0x2e7   : > { %2122 = vmatprep.subr.msk.mxu1 %vm538_vm1, %v757_v0  ;;  %v907_v2 = vmul.f32 %v905_v20, %v2672_v24 }
 0x2e9   : > { %909 = vrot.lane.b32.xlu1 %v907_v2, %s2486_s12 }
 0x2ea   : > { %2123 = vmatpush1.msk.msra.mxu1 %vm538_vm1, %v756_v21 }
 0x2eb   : > { %2124 = vmatmul.mubr.msk.f32.vlgmr.msra.gmra.mrb[0].mxu1 %vm795_vm10, %v2672_v24 }
 0x35b   : > { %v910_v32 = vpop.permute.xlu1 %909 }
 0x35c   : > { %v913_v3 = vsel %vm912_vm11, %v910_v32, 0.0 }
 0x35d   : > { %914 = vadd.xlane.f32.xlu0 %v913_v3 }
 0x3be   : > { %v870_v4 = vpop.f32.mrb[0].mxu1 }
 0x3bf   : > { %v871_v5 = vadd.f32 %v870_v4, %v793_v39  ;;  %v872_v6 = vpop.f32.mrb[1].mxu1 }
 0x3c0   : > { %v873_v7 = vadd.f32 %v872_v6, %v793_v39 }
 0x3c2   : > { %v875_v8 = vadd.f32 %v873_v7, %v871_v5 }
 0x3c4   : > { %876 = vadd.xlane.f32.xlu1 %v875_v8 }
 0x3ea   : > { %v915_v11 = vpop.xlane.xlu0 %914 }
 0x3eb   : > { %v916_v12 = vadd.f32 %v915_v11, %v2672_v24 }
 0x3ed   : > { %923 = vperm.xlu1 %2231, %v916_v12  }
 0x3f1   : > { %2233 = vset.pattern.permute.xlu1 %v2489_v13 }
 0x3f2   : > { %974 = vperm.xlu1 %2233, %v2672_v24  }
 0x451   : > { %v877_v14 = vpop.xlane.xlu1 %876 }
 0x452   : > { %v878_v15 = vmul.f32 0.00390625, %v877_v14 }
 0x454   : > { %v879_v16 = vsub.f32 %v871_v5, %v878_v15  ;;  %v880_v17 = vsub.f32 %v873_v7, %v878_v15  ;;  %v2792_v15 = vmov 0.0  }
 0x456   : > { %v881_v18 = vmul.f32 %v879_v16, %v879_v16  ;;  %v882_v19 = vmul.f32 %v880_v17, %v880_v17 }
 0x458   : > { %v883_v22 = vadd.f32 %v882_v19, %v881_v18 }
 0x45a   : > { %884 = vadd.xlane.f32.xlu0 %v883_v22 }
 0x46c   : > { %v924_v35 = vpop.permute.xlu1 %923 }
 0x470   : > { %968 = vperm.xlu0 %2232, %v2672_v24  }
 0x471   : > { %v975_v10 = vpop.permute.xlu1 %974 }
 0x474   : > { %2234 = vset.pattern.permute.xlu0 %v2489_v13 }
 0x4e7   : > { %v885_v23 = vpop.xlane.xlu0 %884 }
 0x4e8   : > { %v886_v25 = vmul.f32 0.00390625, %v885_v23 }
 0x4ea   : > { %v887_v26 = vadd.f32 1e-05, %v886_v25 }
 0x4ec   : > { %2241 = vrsqrt.f32 %v887_v26 }
 0x4ef   : > { %v969_v6 = vpop.permute.xlu0 %968 }
 0x4f6   : > { %v2242_v27 = vpop.eup %2241 }
 0x4f7   : > { %v889_v31 = vmul.f32 %v2242_v27, %v879_v16  ;;  %v890_v34 = vmul.f32 %v2242_v27, %v880_v17  ;;  %v2794_v16 = vmov 0.0  }
 0x4f9   : > { %v919_v36 = vadd.f32 %v917_v29, %v889_v31  ;;  %v920_v37 = vadd.f32 %v918_v30, %v890_v34 }
 0x4fb   : > { %v2778_v40 = vadd.f32 %v924_v35, %v919_v36  ;;  %v2780_v41 = vadd.f32 %v924_v35, %v920_v37 }
 0x4fd   : > { %3456 = vst [vmem:[#allocation3_spill] sm:$0xff] %v2778_v40  ;;  %3457 = vst [vmem:[#allocation4_spill] sm:$0xff] %v2780_v41  ;;  %v928_v42 = vrot.slane %v2778_v40, 4  ;;  %v934_v43 = vrot.slane %v2780_v41, 4 }
 0x4ff   : > { %v929_v44 = vadd.f32 %v928_v42, %v2778_v40  ;;  %v935_v28 = vadd.f32 %v934_v43, %v2780_v41 }
 0x501   : > { %v930_v45 = vrot.slane %v929_v44, 2  ;;  %v936_v46 = vrot.slane %v935_v28, 2 }
 0x503   : > { %v931_v47 = vadd.f32 %v930_v45, %v929_v44  ;;  %v937_v48 = vadd.f32 %v936_v46, %v935_v28 }
 0x505   : > { %v932_v49 = vrot.slane %v931_v47, 1  ;;  %v938_v38 = vrot.slane %v937_v48, 1 }
 0x507   : > { %v933_v50 = vadd.f32 %v932_v49, %v931_v47  ;;  %v939_v51 = vadd.f32 %v938_v38, %v937_v48 }
 0x509   : > { %v941_v52 = vmul.f32 0.125, %v933_v50  ;;  %v942_v53 = vmul.f32 0.125, %v939_v51 }
 0x50b   : > { %v943_v54 = vsub.f32 %v2778_v40, %v941_v52  ;;  %v944_v55 = vsub.f32 %v2780_v41, %v942_v53 }
 0x50d   : > { %v945_v56 = vmul.f32 %v943_v54, %v943_v54  ;;  %v946_v57 = vmul.f32 %v944_v55, %v944_v55 }
 0x50f   : > { %v947_v58 = vrot.slane %v945_v56, 4  ;;  %v953_v59 = vrot.slane %v946_v57, 4 }
 0x511   : > { %v948_v60 = vadd.f32 %v947_v58, %v945_v56  ;;  %v954_v61 = vadd.f32 %v953_v59, %v946_v57 }
 0x513   : > { %v949_v33 = vrot.slane %v948_v60, 2  ;;  %v955_v62 = vrot.slane %v954_v61, 2 }
 0x515   : > { %v950_v63 = vadd.f32 %v949_v33, %v948_v60  ;;  %v956_v0 = vadd.f32 %v955_v62, %v954_v61 }
 0x517   : > { %v951_v1 = vrot.slane %v950_v63, 1  ;;  %v957_v21 = vrot.slane %v956_v0, 1 }
 0x519   : > { %v952_v20 = vadd.f32 %v951_v1, %v950_v63  ;;  %v958_v2 = vadd.f32 %v957_v21, %v956_v0 }
 0x51b   : > { %v959_v32 = vmul.f32 0.125, %v952_v20  ;;  %v960_v3 = vmul.f32 0.125, %v958_v2 }
 0x51d   : > { %v961_v39 = vadd.f32 1e-05, %v959_v32  ;;  %v962_v4 = vadd.f32 1e-05, %v960_v3 }
 0x51f   : > { %2243 = vrsqrt.f32 %v961_v39 }
 0x520   : > { %2245 = vrsqrt.f32 %v962_v4 }
 0x529   : > { %v2244_v5 = vpop.eup %2243 }
 0x52a   : > { %v2246_v7 = vpop.eup %2245  ;;  %v965_v8 = vmul.f32 %v2244_v5, %v943_v54 }
 0x52b   : > { %v966_v9 = vmul.f32 %v2246_v7, %v944_v55 }
 0x52c   : > { %v971_v11 = vmul.f32 %v969_v6, %v965_v8 }
 0x52d   : > { %v972_v12 = vmul.f32 %v969_v6, %v966_v9 }
 0x52e   : > { %v2788_v13 = vadd.f32 %v975_v10, %v971_v11 }
 0x52f   : > { %v2790_v14 = vadd.f32 %v975_v10, %v972_v12 }
 0x530   : > { %3458 = vst [vmem:[#allocation5_spill] sm:$0xff] %v2788_v13 }
 0x531   : > { %3459 = vst [vmem:[#allocation6_spill] sm:$0xff] %v2790_v14 }
 0x532 LB: >> { %3460 = vst [vmem:[#allocation7_spill] sm:$0xff] %v2463_v15  ;;  %3461 = vst [vmem:[#allocation8_spill] sm:$0xff] %v2467_v16  ;;  %v2490_v17 = vmov 0.0   ;;  %s2126_s20 = sshll.u32 %s2471_s10, 3  ;;  %vm995_vm12 = vcmask 64512   ;;  %v2491_v18 = vmov 8   ;;  %s2471_s10 = sphi %s2796_s10, %s984_s10   ;;  %v2467_v16 = vphi %v2794_v16, %v3531_v16   ;;  %v2463_v15 = vphi %v2792_v15, %v3530_v15  }
 0x533   : >> { %1062 = vmatprep.mubr.f32.mxu0 %v2490_v17  ;;  %2247 = vset.pattern.permute.xlu0 %v2491_v18  ;;  %s988_s23 = scalar_lea.vmem %s3420_s7, %s2126_s20  ;;  %v2492_v22 = vmov 0   ;;  %vm1156_vm13 = vcmask 1040384   ;;  %vm1107_vm14 = vcmask 15360   ;;  %s1913_s26 = scalar_lea.vmem %s3421_s8, %s2126_s20  ;;  %vm1918_vm15 = vcmask 1041408  }
 0x534   : >> { %v989_v19 = vld [vmem:[%s988_s23] sm:$0x3f]  ;;  %1195 = vmatprep.mubr.bf16.mxu1 %v2492_v22  ;;  %s984_s10 = sadd.s32 1, %s2471_s10  }
 0x535   : >> { %992 = vperm.xlu0 %2247, %v989_v19   ;;  %p981_p4 = scmp.ge.s32.totalorder %s984_s10, 4  }
 0x537   : >> { %v3463_v13 = vld [vmem:[#allocation5_spill] sm:$0xff] }
 0x538   : >> { %v3462_v14 = vld [vmem:[#allocation6_spill] sm:$0xff] }
 0x539   : >> { %998 = vmatprep.subr.mxu0 %v3462_v14 }
 0x53a   : >> { %999 = vmatpush1.msra.mxu0 %v3463_v13 }
 0x53b   : >> { %2127 = vmatmul.mubr.msk.f32.vlgmr.msra.gmra.mrb[0].mxu0 %vm995_vm12, %v989_v19 }
 0x5b4   : >> { %v993_v23 = vpop.permute.xlu0 %992 }
 0x60e   : >> { %v1064_v25 = vpop.f32.mrb[0].mxu0 }
 0x60f   : >> { %v1065_v26 = vadd.f32 %v1064_v25, %v993_v23  ;;  %v1066_v27 = vpop.f32.mrb[1].mxu0 }
 0x610   : >> { %v1067_v29 = vadd.f32 %v1066_v27, %v993_v23 }
 0x611   : >> { %v2817_v30 = vpack.c.bf16 %v1065_v26, %v1065_v26 }
 0x612   : >> { %v1070_v31 = vpack.c.bf16 %v1067_v29, %v1067_v29 }
 0x613   : >> { %3464 = vst [vmem:[#allocation9_spill] sm:$0xff] %v2817_v30  ;;  %1071 = vxpose.xlu0.c.b16.start.end [1/1] (short) %v2817_v30, 128  ;;  %v1105_v34 = vrot.slane %v2817_v30, 1 }
 0x614   : >> { %1087 = vxpose.xlu1.c.b16.start.end [1/1] (short) %v1070_v31, 128  ;;  %v1106_v35 = vrot.slane %v1070_v31, 1  ;;  %v1869_v36 = vrot.slane %v1070_v31, 2 }
 0x615   : >> { %v1158_v37 = vsel %vm1156_vm13, %v1105_v34, 0 }
 0x616   : >> { %2128 = vmatprep.subr.msk.bf16.mxu1 %vm1156_vm13, %v1106_v35  ;;  %1904 = vmatprep.mubr.bf16.mxu0 %v1869_v36 }
 0x617   : >> { %1164 = vmatpush1.bf16.msra.mxu1 %v1158_v37 }
 0x679   : >> { %v1079_v42 = vpop.trf.xlu0 }
 0x67a   : >> { %2129 = vmatmul.mubr.msk.bf16.vlgmr.msra.gmra.mrb[0].mxu1 %vm1107_vm14, %v1079_v42  ;;  %v1095_v49 = vpop.trf.xlu1 }
 0x67b   : >> { %1205 = vmatprep.mubr.bf16.mxu1 %v2492_v22 }
 0x67d   : >> { %v1080_v43 = vpop.trf.xlu0 }
 0x67e   : >> { %v1096_v38 = vpop.trf.xlu1 }
 0x681   : >> { %v1081_v44 = vpop.trf.xlu0 }
 0x682   : >> { %2130 = vmatmul.mubr.msk.bf16.gmra.mrb[4].mxu1 %vm1107_vm14, %v1080_v43  ;;  %v1097_v50 = vpop.trf.xlu1 }
 0x683   : >> { %1215 = vmatprep.mubr.bf16.mxu1 %v2492_v22 }
 0x685   : >> { %v1082_v28 = vpop.trf.xlu0 }
 0x686   : >> { %v1098_v51 = vpop.trf.xlu1 }
 0x689   : >> { %v1083_v45 = vpop.trf.xlu0 }
 0x68a   : >> { %2131 = vmatmul.mubr.msk.bf16.gmra.mrb[8].mxu1 %vm1107_vm14, %v1081_v44  ;;  %v1099_v52 = vpop.trf.xlu1 }
 0x68b   : >> { %1225 = vmatprep.mubr.bf16.mxu1 %v2492_v22 }
 0x68d   : >> { %v1084_v46 = vpop.trf.xlu0 }
 0x68e   : >> { %v1100_v53 = vpop.trf.xlu1 }
 0x691   : >> { %v1085_v47 = vpop.trf.xlu0 }
 0x692   : >> { %2132 = vmatmul.mubr.msk.bf16.gmra.mrb[12].mxu1 %vm1107_vm14, %v1082_v28  ;;  %v1101_v54 = vpop.trf.xlu1 }
 0x693   : >> { %1235 = vmatprep.mubr.bf16.mxu1 %v2492_v22 }
 0x695   : >> { %v1086_v48 = vpop.trf.xlu0 }
 0x696   : >> { %v1102_v55 = vpop.trf.xlu1 }
 0x69a   : >> { %2133 = vmatmul.mubr.msk.bf16.gmra.mrb[16].mxu1 %vm1107_vm14, %v1083_v45 }
 0x69b   : >> { %1245 = vmatprep.mubr.bf16.mxu1 %v2492_v22 }
 0x6a2   : >> { %2134 = vmatmul.mubr.msk.bf16.gmra.mrb[20].mxu1 %vm1107_vm14, %v1084_v46 }
 0x6a3   : >> { %1255 = vmatprep.mubr.bf16.mxu1 %v2492_v22 }
 0x6aa   : >> { %2135 = vmatmul.mubr.msk.bf16.gmra.mrb[24].mxu1 %vm1107_vm14, %v1085_v47 }
 0x6ab   : >> { %1265 = vmatprep.mubr.bf16.mxu1 %v2492_v22 }
 0x6b2   : >> { %2136 = vmatmul.mubr.msk.bf16.gmra.mrb[28].mxu1 %vm1107_vm14, %v1086_v48 }
 0x6b3   : >> { %1275 = vmatprep.mubr.bf16.mxu1 %v2492_v22 }
 0x6ba   : >> { %2137 = vmatmul.mubr.msk.bf16.gmra.mrb[32].mxu1 %vm1107_vm14, %v1095_v49 }
 0x6bb   : >> { %1285 = vmatprep.mubr.bf16.mxu1 %v2492_v22 }
 0x6c2   : >> { %2138 = vmatmul.mubr.msk.bf16.gmra.mrb[36].mxu1 %vm1107_vm14, %v1096_v38 }
 0x6c3   : >> { %1295 = vmatprep.mubr.bf16.mxu1 %v2492_v22 }
 0x6ca   : >> { %2139 = vmatmul.mubr.msk.bf16.gmra.mrb[40].mxu1 %vm1107_vm14, %v1097_v50 }
 0x6cb   : >> { %1305 = vmatprep.mubr.bf16.mxu1 %v2492_v22 }
 0x6d2   : >> { %2140 = vmatmul.mubr.msk.bf16.gmra.mrb[44].mxu1 %vm1107_vm14, %v1098_v51 }
 0x6d3   : >> { %1315 = vmatprep.mubr.bf16.mxu1 %v2492_v22 }
 0x6da   : >> { %2141 = vmatmul.mubr.msk.bf16.gmra.mrb[48].mxu1 %vm1107_vm14, %v1099_v52 }
 0x6db   : >> { %1325 = vmatprep.mubr.bf16.mxu1 %v2492_v22 }
 0x6e2   : >> { %2142 = vmatmul.mubr.msk.bf16.gmra.mrb[52].mxu1 %vm1107_vm14, %v1100_v53 }
 0x6e3   : >> { %1335 = vmatprep.mubr.bf16.mxu1 %v2492_v22 }
 0x6ea   : >> { %2143 = vmatmul.mubr.msk.bf16.gmra.mrb[56].mxu1 %vm1107_vm14, %v1101_v54 }
 0x6eb   : >> { %1345 = vmatprep.mubr.bf16.mxu1 %v2492_v22 }
 0x6f2   : >> { %2144 = vmatmul.mubr.msk.bf16.gmra.mrb[60].mxu1 %vm1107_vm14, %v1102_v55 }
 0x6f3   : >> { %1989 = vmatprep.mubr.f32.mxu1 %v2490_v17 }
 0x74d   : >> { %v2853_v56 = vpop.f32.mrb[0].mxu1 }
 0x74e   : >> { %v2855_v57 = vpop.f32.mrb[1].mxu1 }
 0x74f   : >> { %v2857_v58 = vpop.f32.mrb[2].mxu1  ;;  %v1356_v59 = vmax.f32 %v2853_v56, %v2855_v57 }
 0x750   : >> { %v2861_v60 = vpop.f32.mrb[3].mxu1 }
 0x751   : >> { %1357 = vmax.xlane.f32.xlu1 %v1356_v59  ;;  %v1359_v61 = vmax.f32 %v2857_v58, %v2861_v60 }
 0x753   : >> { %1360 = vmax.xlane.f32.xlu0 %v1359_v61 }
 0x755   : >> { %v2865_v33 = vpop.f32.mrb[4].mxu1 }
 0x756   : >> { %v2867_v62 = vpop.f32.mrb[5].mxu1 }
 0x757   : >> { %v2869_v63 = vpop.f32.mrb[6].mxu1  ;;  %v1362_v0 = vmax.f32 %v2865_v33, %v2867_v62 }
 0x758   : >> { %v2873_v1 = vpop.f32.mrb[7].mxu1 }
 0x759   : >> { %1363 = vmax.xlane.f32.xlu1 %v1362_v0  ;;  %v1365_v21 = vmax.f32 %v2869_v63, %v2873_v1 }
 0x75d   : >> { %1366 = vmax.xlane.f32.xlu1 %v1365_v21  ;;  %v2877_v20 = vpop.f32.mrb[8].mxu1 }
 0x75e   : >> { %v2879_v2 = vpop.f32.mrb[9].mxu1 }
 0x75f   : >> { %v2881_v32 = vpop.f32.mrb[10].mxu1  ;;  %v1368_v3 = vmax.f32 %v2877_v20, %v2879_v2 }
 0x760   : >> { %v2885_v39 = vpop.f32.mrb[11].mxu1 }
 0x761   : >> { %1369 = vmax.xlane.f32.xlu1 %v1368_v3  ;;  %v1371_v4 = vmax.f32 %v2881_v32, %v2885_v39 }
 0x765   : >> { %1372 = vmax.xlane.f32.xlu1 %v1371_v4  ;;  %v2889_v5 = vpop.f32.mrb[12].mxu1 }
 0x766   : >> { %v2891_v6 = vpop.f32.mrb[13].mxu1 }
 0x767   : >> { %v2893_v7 = vpop.f32.mrb[14].mxu1  ;;  %v1374_v8 = vmax.f32 %v2889_v5, %v2891_v6 }
 0x768   : >> { %v2897_v9 = vpop.f32.mrb[15].mxu1 }
 0x769   : >> { %1375 = vmax.xlane.f32.xlu1 %v1374_v8  ;;  %v1377_v10 = vmax.f32 %v2893_v7, %v2897_v9 }
 0x76d   : >> { %1378 = vmax.xlane.f32.xlu1 %v1377_v10  ;;  %v2901_v11 = vpop.f32.mrb[16].mxu1 }
 0x76e   : >> { %v2903_v12 = vpop.f32.mrb[17].mxu1 }
 0x76f   : >> { %v1380_v17 = vmax.f32 %v2901_v11, %v2903_v12  ;;  %v2907_v18 = vpop.f32.mrb[18].mxu1 }
 0x770   : >> { %v2909_v19 = vpop.f32.mrb[19].mxu1 }
 0x771   : >> { %1381 = vmax.xlane.f32.xlu1 %v1380_v17  ;;  %v1383_v22 = vmax.f32 %v2907_v18, %v2909_v19 }
 0x775   : >> { %1384 = vmax.xlane.f32.xlu1 %v1383_v22  ;;  %v2913_v23 = vpop.f32.mrb[20].mxu1 }
 0x776   : >> { %v2915_v25 = vpop.f32.mrb[21].mxu1 }
 0x777   : >> { %v2917_v26 = vpop.f32.mrb[22].mxu1  ;;  %v1386_v27 = vmax.f32 %v2913_v23, %v2915_v25 }
 0x778   : >> { %v2921_v29 = vpop.f32.mrb[23].mxu1 }
 0x779   : >> { %1387 = vmax.xlane.f32.xlu0 %v1386_v27  ;;  %v1389_v31 = vmax.f32 %v2917_v26, %v2921_v29 }
 0x77b   : >> { %1390 = vmax.xlane.f32.xlu1 %v1389_v31 }
 0x77d   : >> { %v2925_v34 = vpop.f32.mrb[24].mxu1 }
 0x77e   : >> { %v2927_v35 = vpop.f32.mrb[25].mxu1 }
 0x77f   : >> { %v2929_v36 = vpop.f32.mrb[26].mxu1  ;;  %v1392_v37 = vmax.f32 %v2925_v34, %v2927_v35 }
 0x780   : >> { %v2933_v42 = vpop.f32.mrb[27].mxu1 }
 0x781   : >> { %1393 = vmax.xlane.f32.xlu0 %v1392_v37  ;;  %v1395_v43 = vmax.f32 %v2929_v36, %v2933_v42 }
 0x783   : >> { %1396 = vmax.xlane.f32.xlu1 %v1395_v43 }
 0x785   : >> { %v2937_v44 = vpop.f32.mrb[28].mxu1 }
 0x786   : >> { %v2939_v28 = vpop.f32.mrb[29].mxu1 }
 0x787   : >> { %v2941_v45 = vpop.f32.mrb[30].mxu1  ;;  %v1398_v46 = vmax.f32 %v2937_v44, %v2939_v28 }
 0x788   : >> { %v2945_v47 = vpop.f32.mrb[31].mxu1 }
 0x789   : >> { %1399 = vmax.xlane.f32.xlu0 %v1398_v46  ;;  %v1401_v48 = vmax.f32 %v2941_v45, %v2945_v47 }
 0x78b   : >> { %1402 = vmax.xlane.f32.xlu1 %v1401_v48 }
 0x78d   : >> { %v2949_v49 = vpop.f32.mrb[32].mxu1 }
 0x78e   : >> { %v2951_v38 = vpop.f32.mrb[33].mxu1 }
 0x78f   : >> { %v2953_v50 = vpop.f32.mrb[34].mxu1  ;;  %v1404_v51 = vmax.f32 %v2949_v49, %v2951_v38 }
 0x790   : >> { %v2957_v52 = vpop.f32.mrb[35].mxu1 }
 0x791   : >> { %3465 = vst [vmem:[#allocation10_spill] sm:$0xff] %v2957_v52  ;;  %1405 = vmax.xlane.f32.xlu0 %v1404_v51  ;;  %v1407_v53 = vmax.f32 %v2953_v50, %v2957_v52 }
 0x793   : >> { %1408 = vmax.xlane.f32.xlu1 %v1407_v53 }
 0x795   : >> { %v2961_v54 = vpop.f32.mrb[36].mxu1 }
 0x796   : >> { %3466 = vst [vmem:[#allocation11_spill] sm:$0xff] %v2961_v54  ;;  %v2963_v55 = vpop.f32.mrb[37].mxu1 }
 0x797   : >> { %3467 = vst [vmem:[#allocation12_spill] sm:$0xff] %v2963_v55  ;;  %v2965_v59 = vpop.f32.mrb[38].mxu1  ;;  %v1410_v61 = vmax.f32 %v2961_v54, %v2963_v55 }
 0x798   : >> { %3468 = vst [vmem:[#allocation13_spill] sm:$0xff] %v2965_v59  ;;  %v2969_v0 = vpop.f32.mrb[39].mxu1 }
 0x799   : >> { %3469 = vst [vmem:[#allocation14_spill] sm:$0xff] %v2969_v0  ;;  %1411 = vmax.xlane.f32.xlu0 %v1410_v61  ;;  %v1413_v21 = vmax.f32 %v2965_v59, %v2969_v0 }
 0x79b   : >> { %1414 = vmax.xlane.f32.xlu1 %v1413_v21 }
 0x79d   : >> { %v2973_v3 = vpop.f32.mrb[40].mxu1 }
 0x79e   : >> { %3470 = vst [vmem:[#allocation15_spill] sm:$0xff] %v2973_v3  ;;  %v2975_v4 = vpop.f32.mrb[41].mxu1 }
 0x79f   : >> { %3471 = vst [vmem:[#allocation16_spill] sm:$0xff] %v2975_v4  ;;  %v2977_v8 = vpop.f32.mrb[42].mxu1  ;;  %v1416_v10 = vmax.f32 %v2973_v3, %v2975_v4 }
 0x7a0   : >> { %3472 = vst [vmem:[#allocation17_spill] sm:$0xff] %v2977_v8  ;;  %v2981_v17 = vpop.f32.mrb[43].mxu1 }
 0x7a1   : >> { %3473 = vst [vmem:[#allocation18_spill] sm:$0xff] %v2981_v17  ;;  %1417 = vmax.xlane.f32.xlu0 %v1416_v10  ;;  %v1419_v22 = vmax.f32 %v2977_v8, %v2981_v17 }
 0x7a3   : >> { %1420 = vmax.xlane.f32.xlu1 %v1419_v22 }
 0x7a5   : >> { %v2985_v27 = vpop.f32.mrb[44].mxu1 }
 0x7a6   : >> { %3474 = vst [vmem:[#allocation19_spill] sm:$0xff] %v2985_v27  ;;  %v2987_v31 = vpop.f32.mrb[45].mxu1 }
 0x7a7   : >> { %3475 = vst [vmem:[#allocation20_spill] sm:$0xff] %v2987_v31  ;;  %v2989_v37 = vpop.f32.mrb[46].mxu1  ;;  %v1422_v43 = vmax.f32 %v2985_v27, %v2987_v31 }
 0x7a8   : >> { %3476 = vst [vmem:[#allocation21_spill] sm:$0xff] %v2989_v37  ;;  %v2993_v46 = vpop.f32.mrb[47].mxu1 }
 0x7a9   : >> { %3477 = vst [vmem:[#allocation22_spill] sm:$0xff] %v2993_v46  ;;  %1423 = vmax.xlane.f32.xlu0 %v1422_v43  ;;  %v1425_v48 = vmax.f32 %v2989_v37, %v2993_v46 }
 0x7ab   : >> { %1426 = vmax.xlane.f32.xlu1 %v1425_v48 }
 0x7ad   : >> { %v2997_v51 = vpop.f32.mrb[48].mxu1 }
 0x7ae   : >> { %v2999_v53 = vpop.f32.mrb[49].mxu1 }
 0x7af   : >> { %v3001_v61 = vpop.f32.mrb[50].mxu1 }
 0x7b0   : >> { %v3005_v10 = vpop.f32.mrb[51].mxu1 }
 0x7b5   : >> { %v3009_v13 = vpop.f32.mrb[52].mxu1 }
 0x7b6   : >> { %v3011_v43 = vpop.f32.mrb[53].mxu1 }
 0x7b7   : >> { %v3013_v14 = vpop.f32.mrb[54].mxu1 }
 0x7b8   : >> { %v3017_v41 = vpop.f32.mrb[55].mxu1 }
 0x7bd   : >> { %v3021_v21 = vpop.f32.mrb[56].mxu1 }
 0x7be   : >> { %v3023_v24 = vpop.f32.mrb[57].mxu1 }
 0x7bf   : >> { %v3025_v15 = vpop.f32.mrb[58].mxu1 }
 0x7c0   : >> { %v3029_v16 = vpop.f32.mrb[59].mxu1 }
 0x7c5   : >> { %v3033_v48 = vpop.f32.mrb[60].mxu1 }
 0x7c6   : >> { %v3035_v46 = vpop.f32.mrb[61].mxu1 }
 0x7c7   : >> { %v3037_v37 = vpop.f32.mrb[62].mxu1 }
 0x7c8   : >> { %v3041_v31 = vpop.f32.mrb[63].mxu1 }
 0x7de   : >> { %v1358_v22 = vpop.xlane.xlu1 %1357 }
 0x7df   : >> { %v1452_v17 = vsub.f32 %v2853_v56, %v1358_v22  ;;  %v1453_v8 = vsub.f32 %v2855_v57, %v1358_v22 }
 0x7e0   : >> { %v1361_v30 = vpop.xlane.xlu0 %1360 }
 0x7e1   : >> { %v1516_v4 = vmul.f32 1.442695, %v1452_v17  ;;  %v1518_v3 = vmul.f32 1.442695, %v1453_v8  ;;  %v1454_v0 = vsub.f32 %v2857_v58, %v1361_v30  ;;  %v1455_v59 = vsub.f32 %v2861_v60, %v1361_v30 }
 0x7e3   : >> { %2248 = vpow2.f32 %v1516_v4  ;;  %v1520_v55 = vmul.f32 1.442695, %v1454_v0  ;;  %v1522_v40 = vmul.f32 1.442695, %v1455_v59 }
 0x7e4   : >> { %2250 = vpow2.f32 %v1518_v3 }
 0x7e5   : >> { %2252 = vpow2.f32 %v1520_v55 }
 0x7e6   : >> { %2254 = vpow2.f32 %v1522_v40  ;;  %v1364_v54 = vpop.xlane.xlu1 %1363 }
 0x7e7   : >> { %v1456_v27 = vsub.f32 %v2865_v33, %v1364_v54  ;;  %v1457_v56 = vsub.f32 %v2867_v62, %v1364_v54 }
 0x7e9   : >> { %v1524_v52 = vmul.f32 1.442695, %v1456_v27  ;;  %v1526_v57 = vmul.f32 1.442695, %v1457_v56 }
 0x7ea   : >> { %v1367_v22 = vpop.xlane.xlu1 %1366 }
 0x7eb   : >> { %2256 = vpow2.f32 %v1524_v52  ;;  %v1458_v8 = vsub.f32 %v2869_v63, %v1367_v22  ;;  %v1459_v58 = vsub.f32 %v2873_v1, %v1367_v22 }
 0x7ec   : >> { %2258 = vpow2.f32 %v1526_v57  ;;  %v3478_v57 = vmax.f32 %v2997_v51, %v2999_v53 }
 0x7ed   : >> { %v3053_v30 = vpop.eup %2248  ;;  %v1528_v60 = vmul.f32 1.442695, %v1458_v8  ;;  %v1530_v59 = vmul.f32 1.442695, %v1459_v58 }
 0x7ee   : >> { %v3055_v55 = vpop.eup %2250  ;;  %v1370_v40 = vpop.xlane.xlu1 %1369 }
 0x7ef   : >> { %v3057_v0 = vpop.eup %2252  ;;  %2260 = vpow2.f32 %v1528_v60  ;;  %v1460_v33 = vsub.f32 %v2877_v20, %v1370_v40  ;;  %v1461_v62 = vsub.f32 %v2879_v2, %v1370_v40  ;;  %v1644_v63 = vadd.f32 %v3055_v55, %v3053_v30 }
 0x7f0   : >> { %v3063_v52 = vpop.eup %2254  ;;  %2262 = vpow2.f32 %v1530_v59 }
 0x7f1   : >> { %v1532_v1 = vmul.f32 1.442695, %v1460_v33  ;;  %v1534_v54 = vmul.f32 1.442695, %v1461_v62  ;;  %1645 = vadd.xlane.f32.xlu0 %v1644_v63  ;;  %v1647_v3 = vadd.f32 %v3063_v52, %v3057_v0 }
 0x7f2   : >> { %v1373_v4 = vpop.xlane.xlu1 %1372 }
 0x7f3   : >> { %2264 = vpow2.f32 %v1532_v1  ;;  %v1462_v17 = vsub.f32 %v2881_v32, %v1373_v4  ;;  %v1463_v20 = vsub.f32 %v2885_v39, %v1373_v4  ;;  %1648 = vadd.xlane.f32.xlu1 %v1647_v3  ;;  %v3479_v39 = vmax.f32 %v3001_v61, %v3005_v10 }
 0x7f4   : >> { %2266 = vpow2.f32 %v1534_v54 }
 0x7f5   : >> { %v3069_v2 = vpop.eup %2256  ;;  %v1536_v27 = vmul.f32 1.442695, %v1462_v17  ;;  %v1538_v56 = vmul.f32 1.442695, %v1463_v20  ;;  %1429 = vmax.xlane.f32.xlu0 %v3478_v57  ;;  %v3480_v17 = vmax.f32 %v3009_v13, %v3011_v43 }
 0x7f6   : >> { %v3074_v22 = vpop.eup %2258  ;;  %v1376_v8 = vpop.xlane.xlu1 %1375 }
 0x7f7   : >> { %2268 = vpow2.f32 %v1536_v27  ;;  %v1464_v58 = vsub.f32 %v2889_v5, %v1376_v8  ;;  %v1465_v32 = vsub.f32 %v2891_v6, %v1376_v8  ;;  %1432 = vmax.xlane.f32.xlu1 %v3479_v39  ;;  %v1650_v60 = vadd.f32 %v3074_v22, %v3069_v2 }
 0x7f8   : >> { %2270 = vpow2.f32 %v1538_v56 }
 0x7f9   : >> { %v3083_v59 = vpop.eup %2260  ;;  %v1540_v40 = vmul.f32 1.442695, %v1464_v58  ;;  %v1542_v33 = vmul.f32 1.442695, %v1465_v32  ;;  %1651 = vadd.xlane.f32.xlu0 %v1650_v60  ;;  %v3481_v32 = vmax.f32 %v3013_v14, %v3017_v41 }
 0x7fa   : >> { %v3085_v62 = vpop.eup %2262  ;;  %v1379_v63 = vpop.xlane.xlu1 %1378 }
 0x7fb   : >> { %2272 = vpow2.f32 %v1540_v40  ;;  %v1466_v5 = vsub.f32 %v2893_v7, %v1379_v63  ;;  %v1467_v6 = vsub.f32 %v2897_v9, %v1379_v63  ;;  %v1653_v1 = vadd.f32 %v3085_v62, %v3083_v59 }
 0x7fc   : >> { %2274 = vpow2.f32 %v1542_v33 }
 0x7fd   : >> { %v3091_v54 = vpop.eup %2264  ;;  %v1544_v3 = vmul.f32 1.442695, %v1466_v5  ;;  %v1546_v4 = vmul.f32 1.442695, %v1467_v6  ;;  %1654 = vadd.xlane.f32.xlu1 %v1653_v1  ;;  %1435 = vmax.xlane.f32.xlu0 %v3480_v17  ;;  %v3482_v6 = vmax.f32 %v3021_v21, %v3023_v24 }
 0x7fe   : >> { %v3096_v20 = vpop.eup %2266  ;;  %v1382_v27 = vpop.xlane.xlu1 %1381 }
 0x7ff   : >> { %2276 = vpow2.f32 %v1544_v3  ;;  %v1468_v7 = vsub.f32 %v2901_v11, %v1382_v27  ;;  %v1469_v9 = vsub.f32 %v2903_v12, %v1382_v27  ;;  %v1656_v56 = vadd.f32 %v3096_v20, %v3091_v54 }
 0x800   : >> { %2278 = vpow2.f32 %v1546_v4 }
 0x801   : >> { %v3102_v57 = vpop.eup %2268  ;;  %v1548_v8 = vmul.f32 1.442695, %v1468_v7  ;;  %v1550_v58 = vmul.f32 1.442695, %v1469_v9  ;;  %1657 = vadd.xlane.f32.xlu0 %v1656_v56  ;;  %1438 = vmax.xlane.f32.xlu1 %v3481_v32 }
 0x802   : >> { %v3107_v39 = vpop.eup %2270  ;;  %v1385_v60 = vpop.xlane.xlu1 %1384 }
 0x803   : >> { %2280 = vpow2.f32 %v1548_v8  ;;  %v1470_v11 = vsub.f32 %v2907_v18, %v1385_v60  ;;  %v1471_v12 = vsub.f32 %v2909_v19, %v1385_v60  ;;  %v1659_v40 = vadd.f32 %v3107_v39, %v3102_v57 }
 0x804   : >> { %2282 = vpow2.f32 %v1550_v58  ;;  %v3483_v58 = vmax.f32 %v3025_v15, %v3029_v16 }
 0x805   : >> { %v3113_v33 = vpop.eup %2272  ;;  %v1552_v63 = vmul.f32 1.442695, %v1470_v11  ;;  %v1554_v5 = vmul.f32 1.442695, %v1471_v12  ;;  %1660 = vadd.xlane.f32.xlu1 %v1659_v40  ;;  %1441 = vmax.xlane.f32.xlu0 %v3482_v6 }
 0x806   : >> { %v3118_v1 = vpop.eup %2274  ;;  %v1388_v3 = vpop.xlane.xlu0 %1387 }
 0x807   : >> { %2284 = vpow2.f32 %v1552_v63  ;;  %v1472_v18 = vsub.f32 %v2913_v23, %v1388_v3  ;;  %v1473_v19 = vsub.f32 %v2915_v25, %v1388_v3  ;;  %v1662_v4 = vadd.f32 %v3118_v1, %v3113_v33 }
 0x808   : >> { %2286 = vpow2.f32 %v1554_v5  ;;  %v1391_v17 = vpop.xlane.xlu1 %1390 }
 0x809   : >> { %v3124_v27 = vpop.eup %2276  ;;  %v1556_v7 = vmul.f32 1.442695, %v1472_v18  ;;  %v1558_v9 = vmul.f32 1.442695, %v1473_v19  ;;  %v1474_v56 = vsub.f32 %v2917_v26, %v1391_v17  ;;  %v1475_v8 = vsub.f32 %v2921_v29, %v1391_v17  ;;  %1663 = vadd.xlane.f32.xlu0 %v1662_v4  ;;  %1444 = vmax.xlane.f32.xlu1 %v3483_v58 }
 0x80a   : >> { %v3131_v23 = vpop.eup %2278  ;;  %v3484_v26 = vmax.f32 %v3033_v48, %v3035_v46 }
 0x80b   : >> { %2288 = vpow2.f32 %v1556_v7  ;;  %v1560_v25 = vmul.f32 1.442695, %v1474_v56  ;;  %v1562_v32 = vmul.f32 1.442695, %v1475_v8  ;;  %v1665_v60 = vadd.f32 %v3131_v23, %v3124_v27 }
 0x80c   : >> { %2290 = vpow2.f32 %v1558_v9  ;;  %v3485_v7 = vmax.f32 %v3037_v37, %v3041_v31 }
 0x80d   : >> { %v3135_v11 = vpop.eup %2280  ;;  %2292 = vpow2.f32 %v1560_v25  ;;  %1666 = vadd.xlane.f32.xlu1 %v1665_v60  ;;  %1447 = vmax.xlane.f32.xlu0 %v3484_v26 }
 0x80e   : >> { %v3140_v29 = vpop.eup %2282  ;;  %2294 = vpow2.f32 %v1562_v32  ;;  %v1394_v12 = vpop.xlane.xlu0 %1393 }
 0x80f   : >> { %v1476_v40 = vsub.f32 %v2925_v34, %v1394_v12  ;;  %v1477_v63 = vsub.f32 %v2927_v35, %v1394_v12  ;;  %v1668_v5 = vadd.f32 %v3140_v29, %v3135_v11 }
 0x810   : >> { %v1397_v6 = vpop.xlane.xlu1 %1396 }
 0x811   : >> { %v3146_v3 = vpop.eup %2284  ;;  %v1564_v18 = vmul.f32 1.442695, %v1476_v40  ;;  %v1566_v19 = vmul.f32 1.442695, %v1477_v63  ;;  %v1478_v4 = vsub.f32 %v2929_v36, %v1397_v6  ;;  %v1479_v17 = vsub.f32 %v2933_v42, %v1397_v6  ;;  %1669 = vadd.xlane.f32.xlu0 %v1668_v5  ;;  %1450 = vmax.xlane.f32.xlu1 %v3485_v7 }
 0x812   : >> { %v3153_v34 = vpop.eup %2286 }
 0x813   : >> { %2296 = vpow2.f32 %v1564_v18  ;;  %v1568_v35 = vmul.f32 1.442695, %v1478_v4  ;;  %v1570_v9 = vmul.f32 1.442695, %v1479_v17  ;;  %v1671_v56 = vadd.f32 %v3153_v34, %v3146_v3 }
 0x814   : >> { %2298 = vpow2.f32 %v1566_v19 }
 0x815   : >> { %v3157_v8 = vpop.eup %2288  ;;  %2300 = vpow2.f32 %v1568_v35  ;;  %1672 = vadd.xlane.f32.xlu1 %v1671_v56 }
 0x816   : >> { %v3159_v36 = vpop.eup %2290  ;;  %2302 = vpow2.f32 %v1570_v9  ;;  %v1400_v42 = vpop.xlane.xlu0 %1399 }
 0x817   : >> { %v3161_v58 = vpop.eup %2292  ;;  %v1480_v25 = vsub.f32 %v2937_v44, %v1400_v42  ;;  %v1481_v32 = vsub.f32 %v2939_v28, %v1400_v42  ;;  %v1674_v60 = vadd.f32 %v3159_v36, %v3157_v8 }
 0x818   : >> { %v3167_v26 = vpop.eup %2294  ;;  %v1403_v12 = vpop.xlane.xlu1 %1402 }
 0x819   : >> { %v1572_v40 = vmul.f32 1.442695, %v1480_v25  ;;  %v1574_v63 = vmul.f32 1.442695, %v1481_v32  ;;  %v1482_v5 = vsub.f32 %v2941_v45, %v1403_v12  ;;  %v1483_v6 = vsub.f32 %v2945_v47, %v1403_v12  ;;  %1675 = vadd.xlane.f32.xlu0 %v1674_v60  ;;  %v3486_v60 = vld [vmem:[#allocation10_spill] sm:$0xff] }
 0x81a   : >> { %v1677_v18 = vadd.f32 %v3167_v26, %v3161_v58 }
 0x81b   : >> { %2304 = vpow2.f32 %v1572_v40  ;;  %v1576_v44 = vmul.f32 1.442695, %v1482_v5  ;;  %v1578_v19 = vmul.f32 1.442695, %v1483_v6 }
 0x81c   : >> { %2306 = vpow2.f32 %v1574_v63  ;;  %1678 = vadd.xlane.f32.xlu1 %v1677_v18 }
 0x81d   : >> { %v3173_v28 = vpop.eup %2296  ;;  %2308 = vpow2.f32 %v1576_v44 }
 0x81e   : >> { %v3175_v4 = vpop.eup %2298  ;;  %2310 = vpow2.f32 %v1578_v19  ;;  %v1406_v17 = vpop.xlane.xlu0 %1405  ;;  %v3490_v19 = vld [vmem:[#allocation12_spill] sm:$0xff] }
 0x81f   : >> { %v3177_v7 = vpop.eup %2300  ;;  %v1484_v45 = vsub.f32 %v2949_v49, %v1406_v17  ;;  %v1485_v47 = vsub.f32 %v2951_v38, %v1406_v17  ;;  %v1680_v35 = vadd.f32 %v3175_v4, %v3173_v28 }
 0x820   : >> { %v3183_v9 = vpop.eup %2302  ;;  %v1409_v56 = vpop.xlane.xlu1 %1408 }
 0x821   : >> { %v1580_v42 = vmul.f32 1.442695, %v1484_v45  ;;  %v1582_v25 = vmul.f32 1.442695, %v1485_v47  ;;  %v1486_v32 = vsub.f32 %v2953_v50, %v1409_v56  ;;  %v1487_v12 = vsub.f32 %v3486_v60, %v1409_v56  ;;  %1681 = vadd.xlane.f32.xlu0 %v1680_v35  ;;  %v3489_v50 = vld [vmem:[#allocation11_spill] sm:$0xff]  ;;  %v3493_v60 = vld [vmem:[#allocation14_spill] sm:$0xff] }
 0x822   : >> { %v1683_v40 = vadd.f32 %v3183_v9, %v3177_v7 }
 0x823   : >> { %2312 = vpow2.f32 %v1580_v42  ;;  %v1584_v49 = vmul.f32 1.442695, %v1486_v32  ;;  %v1586_v63 = vmul.f32 1.442695, %v1487_v12 }
 0x824   : >> { %2314 = vpow2.f32 %v1582_v25  ;;  %1684 = vadd.xlane.f32.xlu1 %v1683_v40  ;;  %v3492_v25 = vld [vmem:[#allocation13_spill] sm:$0xff] }
 0x825   : >> { %v3189_v38 = vpop.eup %2304  ;;  %2316 = vpow2.f32 %v1584_v49 }
 0x826   : >> { %3487 = vst [vmem:[#allocation10_spill] sm:$0xff] %v3189_v38  ;;  %v3191_v5 = vpop.eup %2306  ;;  %2318 = vpow2.f32 %v1586_v63  ;;  %v1412_v6 = vpop.xlane.xlu0 %1411 }
 0x827   : >> { %v3193_v18 = vpop.eup %2308  ;;  %v1488_v44 = vsub.f32 %v3489_v50, %v1412_v6  ;;  %v1489_v17 = vsub.f32 %v3490_v19, %v1412_v6  ;;  %v1686_v45 = vadd.f32 %v3191_v5, %v3189_v38  ;;  %v3501_v38 = vld [vmem:[#allocation18_spill] sm:$0xff] }
 0x828   : >> { %3488 = vst [vmem:[#allocation23_spill] sm:$0xff] %v3193_v18  ;;  %v3199_v47 = vpop.eup %2310  ;;  %v1415_v35 = vpop.xlane.xlu1 %1414 }
 0x829   : >> { %3491 = vst [vmem:[#allocation11_spill] sm:$0xff] %v3199_v47  ;;  %v1588_v56 = vmul.f32 1.442695, %v1488_v44  ;;  %v1590_v42 = vmul.f32 1.442695, %v1489_v17  ;;  %v1490_v32 = vsub.f32 %v3492_v25, %v1415_v35  ;;  %v1491_v12 = vsub.f32 %v3493_v60, %v1415_v35  ;;  %1687 = vadd.xlane.f32.xlu0 %v1686_v45  ;;  %v3497_v17 = vld [vmem:[#allocation15_spill] sm:$0xff] }
 0x82a   : >> { %v1689_v40 = vadd.f32 %v3199_v47, %v3193_v18  ;;  %v3498_v45 = vld [vmem:[#allocation16_spill] sm:$0xff] }
 0x82b   : >> { %2320 = vpow2.f32 %v1588_v56  ;;  %v1592_v49 = vmul.f32 1.442695, %v1490_v32  ;;  %v1594_v63 = vmul.f32 1.442695, %v1491_v12 }
 0x82c   : >> { %2322 = vpow2.f32 %v1590_v42  ;;  %1690 = vadd.xlane.f32.xlu1 %v1689_v40  ;;  %v3500_v40 = vld [vmem:[#allocation17_spill] sm:$0xff] }
 0x82d   : >> { %v3205_v6 = vpop.eup %2312  ;;  %2324 = vpow2.f32 %v1592_v49 }
 0x82e   : >> { %3494 = vst [vmem:[#allocation12_spill] sm:$0xff] %v3205_v6  ;;  %v3207_v50 = vpop.eup %2314  ;;  %2326 = vpow2.f32 %v1594_v63  ;;  %v1418_v44 = vpop.xlane.xlu0 %1417 }
 0x82f   : >> { %3495 = vst [vmem:[#allocation13_spill] sm:$0xff] %v3207_v50  ;;  %v3209_v19 = vpop.eup %2316  ;;  %v1492_v35 = vsub.f32 %v3497_v17, %v1418_v44  ;;  %v1493_v25 = vsub.f32 %v3498_v45, %v1418_v44  ;;  %v1692_v56 = vadd.f32 %v3207_v50, %v3205_v6  ;;  %v3504_v6 = vld [vmem:[#allocation21_spill] sm:$0xff] }
 0x830   : >> { %3496 = vst [vmem:[#allocation14_spill] sm:$0xff] %v3209_v19  ;;  %v3215_v32 = vpop.eup %2318  ;;  %v1421_v42 = vpop.xlane.xlu1 %1420 }
 0x831   : >> { %3499 = vst [vmem:[#allocation15_spill] sm:$0xff] %v3215_v32  ;;  %v1596_v60 = vmul.f32 1.442695, %v1492_v35  ;;  %v1598_v12 = vmul.f32 1.442695, %v1493_v25  ;;  %v1494_v49 = vsub.f32 %v3500_v40, %v1421_v42  ;;  %v1495_v18 = vsub.f32 %v3501_v38, %v1421_v42  ;;  %1693 = vadd.xlane.f32.xlu0 %v1692_v56  ;;  %v3502_v40 = vld [vmem:[#allocation19_spill] sm:$0xff] }
 0x832   : >> { %v1695_v63 = vadd.f32 %v3215_v32, %v3209_v19  ;;  %v3503_v56 = vld [vmem:[#allocation20_spill] sm:$0xff]  ;;  %v3505_v19 = vld [vmem:[#allocation22_spill] sm:$0xff] }
 0x833   : >> { %2328 = vpow2.f32 %v1596_v60  ;;  %v1600_v17 = vmul.f32 1.442695, %v1494_v49  ;;  %v1602_v47 = vmul.f32 1.442695, %v1495_v18 }
 0x834   : >> { %2330 = vpow2.f32 %v1598_v12  ;;  %1696 = vadd.xlane.f32.xlu1 %v1695_v63 }
 0x835   : >> { %v3221_v44 = vpop.eup %2320  ;;  %2332 = vpow2.f32 %v1600_v17 }
 0x836   : >> { %v3223_v45 = vpop.eup %2322  ;;  %2334 = vpow2.f32 %v1602_v47  ;;  %v1424_v35 = vpop.xlane.xlu0 %1423 }
 0x837   : >> { %v3225_v25 = vpop.eup %2324  ;;  %v1496_v38 = vsub.f32 %v3502_v40, %v1424_v35  ;;  %v1497_v42 = vsub.f32 %v3503_v56, %v1424_v35  ;;  %v1698_v60 = vadd.f32 %v3223_v45, %v3221_v44 }
 0x838   : >> { %v3231_v49 = vpop.eup %2326  ;;  %v1427_v18 = vpop.xlane.xlu1 %1426 }
 0x839   : >> { %v1604_v12 = vmul.f32 1.442695, %v1496_v38  ;;  %v1606_v63 = vmul.f32 1.442695, %v1497_v42  ;;  %v1498_v17 = vsub.f32 %v3504_v6, %v1427_v18  ;;  %v1499_v32 = vsub.f32 %v3505_v19, %v1427_v18  ;;  %1699 = vadd.xlane.f32.xlu0 %v1698_v60 }
 0x83a   : >> { %v1701_v47 = vadd.f32 %v3231_v49, %v3225_v25 }
 0x83b   : >> { %2336 = vpow2.f32 %v1604_v12  ;;  %v1608_v40 = vmul.f32 1.442695, %v1498_v17  ;;  %v1610_v50 = vmul.f32 1.442695, %v1499_v32 }
 0x83c   : >> { %2338 = vpow2.f32 %v1606_v63  ;;  %1702 = vadd.xlane.f32.xlu1 %v1701_v47 }
 0x83d   : >> { %v3237_v35 = vpop.eup %2328  ;;  %2340 = vpow2.f32 %v1608_v40 }
 0x83e   : >> { %3506 = vst [vmem:[#allocation16_spill] sm:$0xff] %v3237_v35  ;;  %v3239_v56 = vpop.eup %2330  ;;  %2342 = vpow2.f32 %v1610_v50 }
 0x83f   : >> { %v3241_v38 = vpop.eup %2332  ;;  %v1704_v6 = vadd.f32 %v3239_v56, %v3237_v35 }
 0x840   : >> { %3507 = vst [vmem:[#allocation17_spill] sm:$0xff] %v3241_v38  ;;  %v3245_v19 = vpop.eup %2334 }
 0x841   : >> { %3508 = vst [vmem:[#allocation18_spill] sm:$0xff] %v3245_v19  ;;  %1705 = vadd.xlane.f32.xlu0 %v1704_v6  ;;  %v1707_v42 = vadd.f32 %v3245_v19, %v3241_v38 }
 0x843   : >> { %1708 = vadd.xlane.f32.xlu1 %v1707_v42 }
 0x845   : >> { %v3249_v32 = vpop.eup %2336 }
 0x846   : >> { %3509 = vst [vmem:[#allocation19_spill] sm:$0xff] %v3249_v32  ;;  %v3251_v60 = vpop.eup %2338 }
 0x847   : >> { %3510 = vst [vmem:[#allocation20_spill] sm:$0xff] %v3251_v60  ;;  %v3253_v18 = vpop.eup %2340  ;;  %v1710_v50 = vadd.f32 %v3251_v60, %v3249_v32 }
 0x848   : >> { %3511 = vst [vmem:[#allocation21_spill] sm:$0xff] %v3253_v18  ;;  %v3257_v12 = vpop.eup %2342 }
 0x849   : >> { %3512 = vst [vmem:[#allocation22_spill] sm:$0xff] %v3257_v12  ;;  %1711 = vadd.xlane.f32.xlu0 %v1710_v50  ;;  %v1713_v63 = vadd.f32 %v3257_v12, %v3253_v18 }
 0x84b   : >> { %1714 = vadd.xlane.f32.xlu1 %v1713_v63 }
 0x87e   : >> { %v1646_v17 = vpop.xlane.xlu0 %1645 }
 0x87f   : >> { %2344 = vrcp.f32 %v1646_v17 }
 0x880   : >> { %v1649_v47 = vpop.xlane.xlu1 %1648 }
 0x881   : >> { %2346 = vrcp.f32 %v1649_v47 }
 0x882   : >> { %v1430_v40 = vpop.xlane.xlu0 %1429 }
 0x883   : >> { %v1500_v6 = vsub.f32 %v2997_v51, %v1430_v40  ;;  %v1501_v42 = vsub.f32 %v2999_v53, %v1430_v40 }
 0x884   : >> { %v1433_v35 = vpop.xlane.xlu1 %1432 }
 0x885   : >> { %v1612_v38 = vmul.f32 1.442695, %v1500_v6  ;;  %v1614_v19 = vmul.f32 1.442695, %v1501_v42  ;;  %v1502_v32 = vsub.f32 %v3001_v61, %v1433_v35  ;;  %v1503_v50 = vsub.f32 %v3005_v10, %v1433_v35 }
 0x886   : >> { %v1652_v60 = vpop.xlane.xlu0 %1651 }
 0x887   : >> { %2348 = vpow2.f32 %v1612_v38  ;;  %v1616_v18 = vmul.f32 1.442695, %v1502_v32  ;;  %v1618_v63 = vmul.f32 1.442695, %v1503_v50 }
 0x888   : >> { %2350 = vpow2.f32 %v1614_v19 }
 0x889   : >> { %v2345_v17 = vpop.eup %2344  ;;  %2352 = vpow2.f32 %v1616_v18 }
 0x88a   : >> { %2354 = vpow2.f32 %v1618_v63  ;;  %v1655_v47 = vpop.xlane.xlu1 %1654  ;;  %v1436_v12 = vpop.xlane.xlu0 %1435  ;;  %v1773_v61 = vmul.f32 %v2345_v17, %v3055_v55  ;;  %v1772_v35 = vmul.f32 %v2345_v17, %v3053_v30 }
 0x88b   : >> { %v2347_v51 = vpop.eup %2346  ;;  %2356 = vrcp.f32 %v1652_v60  ;;  %v1504_v53 = vsub.f32 %v3009_v13, %v1436_v12  ;;  %v1505_v40 = vsub.f32 %v3011_v43, %v1436_v12 }
 0x88c   : >> { %2358 = vrcp.f32 %v1655_v47  ;;  %v1775_v10 = vmul.f32 %v2347_v51, %v3063_v52  ;;  %v1774_v38 = vmul.f32 %v2347_v51, %v3057_v0 }
 0x88d   : >> { %v1620_v19 = vmul.f32 1.442695, %v1504_v53  ;;  %v1622_v32 = vmul.f32 1.442695, %v1505_v40 }
 0x88e   : >> { %v1658_v18 = vpop.xlane.xlu0 %1657  ;;  %v1439_v6 = vpop.xlane.xlu1 %1438  ;;  %v1837_v42 = vpack.c.bf16 %v1775_v10, %v1773_v61  ;;  %v1836_v50 = vpack.c.bf16 %v1774_v38, %v1772_v35 }
 0x88f   : >> { %2360 = vpow2.f32 %v1620_v19  ;;  %v1506_v13 = vsub.f32 %v3013_v14, %v1439_v6  ;;  %v1507_v43 = vsub.f32 %v3017_v41, %v1439_v6 }
 0x890   : >> { %2362 = vpow2.f32 %v1622_v32  ;;  %1872 = vmatprep.subr.bf16.mxu0 %v1837_v42 }
 0x891   : >> { %v3273_v55 = vpop.eup %2348  ;;  %2364 = vrcp.f32 %v1658_v18  ;;  %v1624_v52 = vmul.f32 1.442695, %v1506_v13  ;;  %v1626_v30 = vmul.f32 1.442695, %v1507_v43  ;;  %1873 = vmatpush1.bf16.xpose.msra.mxu0 %v1836_v50 }
 0x892   : >> { %v3275_v0 = vpop.eup %2350  ;;  %v1661_v60 = vpop.xlane.xlu1 %1660 }
 0x893   : >> { %v1442_v12 = vpop.xlane.xlu0 %1441  ;;  %v3277_v63 = vpop.eup %2352  ;;  %2366 = vpow2.f32 %v1624_v52  ;;  %v1716_v41 = vadd.f32 %v3275_v0, %v3273_v55 }
 0x894   : >> { %v1508_v17 = vsub.f32 %v3021_v21, %v1442_v12  ;;  %v1509_v14 = vsub.f32 %v3023_v24, %v1442_v12  ;;  %v3283_v47 = vpop.eup %2354  ;;  %2368 = vpow2.f32 %v1626_v30 }
 0x895   : >> { %v2357_v51 = vpop.eup %2356  ;;  %2370 = vrcp.f32 %v1661_v60  ;;  %1717 = vadd.xlane.f32.xlu0 %v1716_v41  ;;  %v1719_v61 = vadd.f32 %v3283_v47, %v3277_v63 }
 0x896   : >> { %v1628_v53 = vmul.f32 1.442695, %v1508_v17  ;;  %v1630_v40 = vmul.f32 1.442695, %v1509_v14  ;;  %v2359_v10 = vpop.eup %2358  ;;  %v1445_v38 = vpop.xlane.xlu1 %1444  ;;  %v1777_v21 = vmul.f32 %v2357_v51, %v3074_v22  ;;  %v1776_v18 = vmul.f32 %v2357_v51, %v3069_v2 }
 0x897   : >> { %v1664_v35 = vpop.xlane.xlu0 %1663  ;;  %v1510_v24 = vsub.f32 %v3025_v15, %v1445_v38  ;;  %v1511_v19 = vsub.f32 %v3029_v16, %v1445_v38  ;;  %1720 = vadd.xlane.f32.xlu1 %v1719_v61  ;;  %v1779_v32 = vmul.f32 %v2359_v10, %v3085_v62  ;;  %v1778_v6 = vmul.f32 %v2359_v10, %v3083_v59 }
 0x898   : >> { %2372 = vpow2.f32 %v1628_v53 }
 0x899   : >> { %2374 = vpow2.f32 %v1630_v40  ;;  %v3293_v42 = vpop.eup %2360  ;;  %v1632_v50 = vmul.f32 1.442695, %v1510_v24  ;;  %v1634_v13 = vmul.f32 1.442695, %v1511_v19  ;;  %v1839_v43 = vpack.c.bf16 %v1779_v32, %v1777_v21 }
 0x89a   : >> { %v3295_v52 = vpop.eup %2362  ;;  %2376 = vrcp.f32 %v1664_v35  ;;  %v1667_v22 = vpop.xlane.xlu1 %1666  ;;  %v1838_v30 = vpack.c.bf16 %v1778_v6, %v1776_v18 }
 0x89b   : >> { %v1448_v15 = vpop.xlane.xlu0 %1447  ;;  %v2365_v16 = vpop.eup %2364  ;;  %2378 = vpow2.f32 %v1632_v50  ;;  %1874 = vmatprep.subr.bf16.mxu0 %v1839_v43  ;;  %v1722_v59 = vadd.f32 %v3295_v52, %v3293_v42 }
 0x89c   : >> { %v1512_v62 = vsub.f32 %v3033_v48, %v1448_v15  ;;  %v1513_v2 = vsub.f32 %v3035_v46, %v1448_v15  ;;  %2380 = vpow2.f32 %v1634_v13  ;;  %1875 = vmatpush1.bf16.xpose.msra.mxu0 %v1838_v30  ;;  %v1781_v51 = vmul.f32 %v2365_v16, %v3096_v20 }
 0x89d   : >> { %v3301_v60 = vpop.eup %2366  ;;  %2382 = vrcp.f32 %v1667_v22  ;;  %1723 = vadd.xlane.f32.xlu0 %v1722_v59  ;;  %v1780_v35 = vmul.f32 %v2365_v16, %v3091_v54 }
 0x89e   : >> { %v1636_v12 = vmul.f32 1.442695, %v1512_v62  ;;  %v1638_v17 = vmul.f32 1.442695, %v1513_v2  ;;  %v3303_v14 = vpop.eup %2368  ;;  %v1451_v41 = vpop.xlane.xlu1 %1450 }
 0x89f   : >> { %v2371_v53 = vpop.eup %2370  ;;  %v1670_v48 = vpop.xlane.xlu0 %1669  ;;  %v1514_v46 = vsub.f32 %v3037_v37, %v1451_v41  ;;  %v1515_v40 = vsub.f32 %v3041_v31, %v1451_v41  ;;  %v1725_v61 = vadd.f32 %v3303_v14, %v3301_v60 }
 0x8a0   : >> { %2384 = vpow2.f32 %v1636_v12  ;;  %v1783_v10 = vmul.f32 %v2371_v53, %v3107_v39  ;;  %v1782_v38 = vmul.f32 %v2371_v53, %v3102_v57 }
 0x8a1   : >> { %2386 = vpow2.f32 %v1638_v17  ;;  %v1640_v20 = vmul.f32 1.442695, %v1514_v46  ;;  %v1642_v24 = vmul.f32 1.442695, %v1515_v40  ;;  %1726 = vadd.xlane.f32.xlu1 %v1725_v61 }
 0x8a2   : >> { %v3313_v21 = vpop.eup %2372  ;;  %2388 = vrcp.f32 %v1670_v48  ;;  %v1841_v37 = vpack.c.bf16 %v1783_v10, %v1781_v51  ;;  %v1673_v31 = vpop.xlane.xlu1 %1672  ;;  %v1840_v32 = vpack.c.bf16 %v1782_v38, %v1780_v35 }
 0x8a3   : >> { %v3315_v19 = vpop.eup %2374  ;;  %2390 = vpow2.f32 %v1640_v20 }
 0x8a4   : >> { %v1728_v18 = vadd.f32 %v3315_v19, %v3313_v21  ;;  %v2377_v39 = vpop.eup %2376  ;;  %2392 = vpow2.f32 %v1642_v24  ;;  %1876 = vmatprep.subr.bf16.mxu0 %v1841_v37 }
 0x8a5   : >> { %v3319_v54 = vpop.eup %2378  ;;  %2394 = vrcp.f32 %v1673_v31  ;;  %1877 = vmatpush1.bf16.xpose.msra.mxu0 %v1840_v32  ;;  %v1785_v43 = vmul.f32 %v2377_v39, %v3118_v1  ;;  %v1784_v15 = vmul.f32 %v2377_v39, %v3113_v33 }
 0x8a6   : >> { %1729 = vadd.xlane.f32.xlu0 %v1728_v18  ;;  %v3321_v57 = vpop.eup %2380  ;;  %v1676_v6 = vpop.xlane.xlu0 %1675 }
 0x8a7   : >> { %v2383_v50 = vpop.eup %2382  ;;  %v1731_v13 = vadd.f32 %v3321_v57, %v3319_v54  ;;  %2396 = vrcp.f32 %v1676_v6 }
 0x8a8   : >> { %v1787_v22 = vmul.f32 %v2383_v50, %v3131_v23  ;;  %v1786_v30 = vmul.f32 %v2383_v50, %v3124_v27 }
 0x8a9   : >> { %1732 = vadd.xlane.f32.xlu1 %v1731_v13  ;;  %v1679_v62 = vpop.xlane.xlu1 %1678 }
 0x8aa   : >> { %v3329_v16 = vpop.eup %2384  ;;  %2398 = vrcp.f32 %v1679_v62  ;;  %v1843_v59 = vpack.c.bf16 %v1787_v22, %v1785_v43  ;;  %v1842_v12 = vpack.c.bf16 %v1786_v30, %v1784_v15  ;;  %v3513_v62 = vld [vmem:[#allocation11_spill] sm:$0xff] }
 0x8ab   : >> { %v3331_v2 = vpop.eup %2386 }
 0x8ac   : >> { %v1734_v17 = vadd.f32 %v3331_v2, %v3329_v16  ;;  %v2389_v1 = vpop.eup %2388  ;;  %1878 = vmatprep.subr.bf16.mxu0 %v1843_v59 }
 0x8ad   : >> { %v3335_v41 = vpop.eup %2390  ;;  %1879 = vmatpush1.bf16.xpose.msra.mxu0 %v1842_v12  ;;  %v1789_v53 = vmul.f32 %v2389_v1, %v3140_v29  ;;  %v1788_v46 = vmul.f32 %v2389_v1, %v3135_v11  ;;  %v3514_v12 = vld [vmem:[#allocation23_spill] sm:$0xff]  ;;  %v3515_v1 = vld [vmem:[#allocation10_spill] sm:$0xff] }
 0x8ae   : >> { %1735 = vadd.xlane.f32.xlu0 %v1734_v17  ;;  %v3337_v33 = vpop.eup %2392  ;;  %v1682_v27 = vpop.xlane.xlu0 %1681 }
 0x8af   : >> { %v2395_v23 = vpop.eup %2394  ;;  %v1737_v51 = vadd.f32 %v3337_v33, %v3335_v41  ;;  %2400 = vrcp.f32 %v1682_v27 }
 0x8b0   : >> { %v1791_v48 = vmul.f32 %v2395_v23, %v3153_v34  ;;  %v1790_v40 = vmul.f32 %v2395_v23, %v3146_v3 }
 0x8b1   : >> { %1738 = vadd.xlane.f32.xlu1 %v1737_v51  ;;  %v1685_v61 = vpop.xlane.xlu1 %1684  ;;  %v2397_v10 = vpop.eup %2396 }
 0x8b2   : >> { %2402 = vrcp.f32 %v1685_v61  ;;  %v1845_v35 = vpack.c.bf16 %v1791_v48, %v1789_v53  ;;  %v1844_v38 = vpack.c.bf16 %v1790_v40, %v1788_v46  ;;  %v1793_v24 = vmul.f32 %v2397_v10, %v3159_v36  ;;  %v3516_v53 = vld [vmem:[#allocation13_spill] sm:$0xff]  ;;  %v3517_v46 = vld [vmem:[#allocation15_spill] sm:$0xff] }
 0x8b3   : >> { %v1792_v3 = vmul.f32 %v2397_v10, %v3157_v8  ;;  %v3518_v10 = vld [vmem:[#allocation14_spill] sm:$0xff] }
 0x8b4   : >> { %v2399_v20 = vpop.eup %2398  ;;  %1880 = vmatprep.subr.bf16.mxu0 %v1845_v35 }
 0x8b5   : >> { %1881 = vmatpush1.bf16.xpose.msra.mxu0 %v1844_v38  ;;  %v1795_v29 = vmul.f32 %v2399_v20, %v3167_v26  ;;  %v1794_v34 = vmul.f32 %v2399_v20, %v3161_v58  ;;  %v3519_v20 = vld [vmem:[#allocation12_spill] sm:$0xff] }
 0x8b6   : >> { %v1688_v37 = vpop.xlane.xlu0 %1687 }
 0x8b7   : >> { %v1847_v31 = vpack.c.bf16 %v1795_v29, %v1793_v24  ;;  %2404 = vrcp.f32 %v1688_v37  ;;  %v1846_v18 = vpack.c.bf16 %v1794_v34, %v1792_v3 }
 0x8b9   : >> { %1882 = vmatprep.subr.bf16.mxu0 %v1847_v31  ;;  %v1691_v11 = vpop.xlane.xlu1 %1690  ;;  %v2401_v32 = vpop.eup %2400 }
 0x8ba   : >> { %2406 = vrcp.f32 %v1691_v11  ;;  %v1797_v6 = vmul.f32 %v2401_v32, %v3175_v4  ;;  %v1796_v43 = vmul.f32 %v2401_v32, %v3173_v28 }
 0x8bc   : >> { %v2403_v39 = vpop.eup %2402 }
 0x8bd   : >> { %1883 = vmatpush1.bf16.xpose.msra.mxu0 %v1846_v18  ;;  %v1799_v36 = vmul.f32 %v2403_v39, %v3183_v9  ;;  %v1798_v13 = vmul.f32 %v2403_v39, %v3177_v7 }
 0x8be   : >> { %v1694_v50 = vpop.xlane.xlu0 %1693 }
 0x8bf   : >> { %v1849_v26 = vpack.c.bf16 %v1799_v36, %v1797_v6  ;;  %2408 = vrcp.f32 %v1694_v50  ;;  %v1848_v8 = vpack.c.bf16 %v1798_v13, %v1796_v43 }
 0x8c1   : >> { %1884 = vmatprep.subr.bf16.mxu0 %v1849_v26  ;;  %v1697_v58 = vpop.xlane.xlu1 %1696  ;;  %v2405_v22 = vpop.eup %2404 }
 0x8c2   : >> { %2410 = vrcp.f32 %v1697_v58  ;;  %v1801_v30 = vmul.f32 %v2405_v22, %v3191_v5  ;;  %v1800_v27 = vmul.f32 %v2405_v22, %v3515_v1  ;;  %v3520_v58 = vld [vmem:[#allocation18_spill] sm:$0xff] }
 0x8c4   : >> { %v2407_v15 = vpop.eup %2406 }
 0x8c5   : >> { %1885 = vmatpush1.bf16.xpose.msra.mxu0 %v1848_v8  ;;  %v1803_v4 = vmul.f32 %v2407_v15, %v3513_v62  ;;  %v1802_v17 = vmul.f32 %v2407_v15, %v3514_v12  ;;  %v3522_v15 = vld [vmem:[#allocation16_spill] sm:$0xff] }
 0x8c6   : >> { %v1700_v59 = vpop.xlane.xlu0 %1699 }
 0x8c7   : >> { %v1851_v9 = vpack.c.bf16 %v1803_v4, %v1801_v30  ;;  %2412 = vrcp.f32 %v1700_v59  ;;  %v1850_v28 = vpack.c.bf16 %v1802_v17, %v1800_v27  ;;  %v3523_v4 = vld [vmem:[#allocation20_spill] sm:$0xff]  ;;  %v3525_v17 = vld [vmem:[#allocation21_spill] sm:$0xff] }
 0x8c9   : >> { %1886 = vmatprep.subr.bf16.mxu0 %v1851_v9  ;;  %v1703_v7 = vpop.xlane.xlu1 %1702  ;;  %v2409_v23 = vpop.eup %2408  ;;  %v3524_v9 = vld [vmem:[#allocation22_spill] sm:$0xff] }
 0x8ca   : >> { %2414 = vrcp.f32 %v1703_v7  ;;  %v1805_v48 = vmul.f32 %v2409_v23, %v3516_v53  ;;  %v1804_v24 = vmul.f32 %v2409_v23, %v3519_v20  ;;  %v3526_v7 = vld [vmem:[#allocation19_spill] sm:$0xff] }
 0x8cc   : >> { %v2411_v51 = vpop.eup %2410 }
 0x8cd   : >> { %1887 = vmatpush1.bf16.xpose.msra.mxu0 %v1850_v28  ;;  %v1807_v5 = vmul.f32 %v2411_v51, %v3517_v46  ;;  %v1806_v35 = vmul.f32 %v2411_v51, %v3518_v10 }
 0x8ce   : >> { %v1706_v40 = vpop.xlane.xlu0 %1705 }
 0x8cf   : >> { %2416 = vrcp.f32 %v1706_v40  ;;  %v1853_v61 = vpack.c.bf16 %v1807_v5, %v1805_v48  ;;  %v1852_v37 = vpack.c.bf16 %v1806_v35, %v1804_v24 }
 0x8d0   : >> { %v1709_v38 = vpop.xlane.xlu1 %1708 }
 0x8d1   : >> { %1888 = vmatprep.subr.bf16.mxu0 %v1853_v61  ;;  %2418 = vrcp.f32 %v1709_v38  ;;  %v2413_v29 = vpop.eup %2412 }
 0x8d2   : >> { %v1809_v34 = vmul.f32 %v2413_v29, %v3223_v45  ;;  %v1808_v36 = vmul.f32 %v2413_v29, %v3221_v44 }
 0x8d4   : >> { %v2415_v31 = vpop.eup %2414 }
 0x8d5   : >> { %1889 = vmatpush1.bf16.xpose.msra.mxu0 %v1852_v37  ;;  %v1811_v11 = vmul.f32 %v2415_v31, %v3231_v49  ;;  %v1810_v18 = vmul.f32 %v2415_v31, %v3225_v25  ;;  %v3521_v49 = vld [vmem:[#allocation17_spill] sm:$0xff] }
 0x8d6   : >> { %v1712_v3 = vpop.xlane.xlu0 %1711 }
 0x8d7   : >> { %2420 = vrcp.f32 %v1712_v3  ;;  %v1855_v32 = vpack.c.bf16 %v1811_v11, %v1809_v34  ;;  %v1854_v26 = vpack.c.bf16 %v1810_v18, %v1808_v36 }
 0x8d8   : >> { %v1715_v39 = vpop.xlane.xlu1 %1714 }
 0x8d9   : >> { %v2417_v6 = vpop.eup %2416  ;;  %1890 = vmatprep.subr.bf16.mxu0 %v1855_v32  ;;  %2422 = vrcp.f32 %v1715_v39 }
 0x8da   : >> { %v1813_v13 = vmul.f32 %v2417_v6, %v3239_v56  ;;  %v1812_v25 = vmul.f32 %v2417_v6, %v3522_v15 }
 0x8db   : >> { %v2419_v50 = vpop.eup %2418 }
 0x8dc   : >> { %v1815_v43 = vmul.f32 %v2419_v50, %v3520_v58  ;;  %v1814_v22 = vmul.f32 %v2419_v50, %v3521_v49 }
 0x8dd   : >> { %1891 = vmatpush1.bf16.xpose.msra.mxu0 %v1854_v26 }
 0x8de   : >> { %v1857_v45 = vpack.c.bf16 %v1815_v43, %v1813_v13  ;;  %v1856_v62 = vpack.c.bf16 %v1814_v22, %v1812_v25  ;;  %v3528_v22 = vld [vmem:[#allocation8_spill] sm:$0xff]  ;;  %v3529_v25 = vld [vmem:[#allocation7_spill] sm:$0xff] }
 0x8e0   : >> { %1892 = vmatprep.subr.bf16.mxu0 %v1857_v45  ;;  %v1914_v45 = vld [vmem:[%s1913_s26] sm:$0xff] }
 0x8e1   : >> { %v2421_v8 = vpop.eup %2420 }
 0x8e2   : >> { %v1817_v59 = vmul.f32 %v2421_v8, %v3523_v4  ;;  %v1816_v1 = vmul.f32 %v2421_v8, %v3526_v7  ;;  %v3532_v4 = vld [vmem:[#allocation2_spill] sm:$0xff] (%p981_p4) }
 0x8e3   : >> { %v2423_v30 = vpop.eup %2422 }
 0x8e4   : >> { %v1819_v44 = vmul.f32 %v2423_v30, %v3524_v9  ;;  %v1818_v56 = vmul.f32 %v2423_v30, %v3525_v17 }
 0x8e5   : >> { %1893 = vmatpush1.bf16.xpose.msra.mxu0 %v1856_v62  ;;  %v2493_v62 = vmov (%p981_p4), 72  }
 0x8e6   : >> { %v1859_v12 = vpack.c.bf16 %v1819_v44, %v1817_v59  ;;  %v1858_v27 = vpack.c.bf16 %v1818_v56, %v1816_v1  ;;  %2440 = vset.pattern.permute.xlu0 (%p981_p4), %v2493_v62  ;;  %v3534_v56 = vld [vmem:[#allocation4_spill] sm:$0xff] (%p981_p4) }
 0x8e7   : > { %1999 = vperm.xlu0 (%p981_p4), %2440, %v3532_v4  }
 0x8e8   : >> { %1894 = vmatprep.subr.bf16.mxu0 %v1859_v12  ;;  %v3533_v12 = vld [vmem:[#allocation3_spill] sm:$0xff] (%p981_p4) }
 0x8ed   : >> { %1895 = vmatpush1.bf16.xpose.msra.mxu0 %v1858_v27 }
 0x922   : >> { %v1718_v23 = vpop.xlane.xlu0 %1717 }
 0x923   : >> { %2424 = vrcp.f32 %v1718_v23 }
 0x924   : >> { %v1721_v28 = vpop.xlane.xlu1 %1720 }
 0x925   : >> { %2426 = vrcp.f32 %v1721_v28 }
 0x92a   : >> { %v1724_v51 = vpop.xlane.xlu0 %1723 }
 0x92b   : >> { %2428 = vrcp.f32 %v1724_v51 }
 0x92d   : >> { %v2425_v53 = vpop.eup %2424 }
 0x92e   : >> { %v1727_v48 = vpop.xlane.xlu1 %1726  ;;  %v1821_v5 = vmul.f32 %v2425_v53, %v3275_v0  ;;  %v1820_v61 = vmul.f32 %v2425_v53, %v3273_v55 }
 0x92f   : >> { %v2427_v46 = vpop.eup %2426  ;;  %2430 = vrcp.f32 %v1727_v48 }
 0x930   : >> { %v1823_v40 = vmul.f32 %v2427_v46, %v3283_v47  ;;  %v1822_v10 = vmul.f32 %v2427_v46, %v3277_v63 }
 0x932   : >> { %v1861_v38 = vpack.c.bf16 %v1823_v40, %v1821_v5  ;;  %v1860_v20 = vpack.c.bf16 %v1822_v10, %v1820_v61 }
 0x933   : >> { %v1730_v35 = vpop.xlane.xlu0 %1729 }
 0x934   : >> { %1896 = vmatprep.subr.bf16.mxu0 %v1861_v38  ;;  %2432 = vrcp.f32 %v1730_v35 }
 0x935   : >> { %1897 = vmatpush1.bf16.xpose.msra.mxu0 %v1860_v20  ;;  %v2429_v29 = vpop.eup %2428 }
 0x936   : >> { %v1733_v24 = vpop.xlane.xlu1 %1732  ;;  %v1825_v34 = vmul.f32 %v2429_v29, %v3295_v52  ;;  %v1824_v47 = vmul.f32 %v2429_v29, %v3293_v42 }
 0x937   : >> { %2434 = vrcp.f32 %v1733_v24 }
 0x939   : >> { %v2431_v37 = vpop.eup %2430 }
 0x93a   : >> { %v1827_v0 = vmul.f32 %v2431_v37, %v3303_v14  ;;  %v1826_v55 = vmul.f32 %v2431_v37, %v3301_v60 }
 0x93b   : >> { %v1736_v31 = vpop.xlane.xlu0 %1735 }
 0x93c   : >> { %v1863_v63 = vpack.c.bf16 %v1827_v0, %v1825_v34  ;;  %v1862_v11 = vpack.c.bf16 %v1826_v55, %v1824_v47  ;;  %2436 = vrcp.f32 %v1736_v31 }
 0x93e   : >> { %1898 = vmatprep.subr.bf16.mxu0 %v1863_v63  ;;  %v1739_v3 = vpop.xlane.xlu1 %1738  ;;  %v2433_v32 = vpop.eup %2432 }
 0x93f   : >> { %2438 = vrcp.f32 %v1739_v3  ;;  %1899 = vmatpush1.bf16.xpose.msra.mxu0 %v1862_v11  ;;  %v1829_v39 = vmul.f32 %v2433_v32, %v3315_v19  ;;  %v1828_v52 = vmul.f32 %v2433_v32, %v3313_v21  ;;  %v3527_v21 = vld [vmem:[#allocation9_spill] sm:$0xff] }
 0x941   : >> { %v2435_v18 = vpop.eup %2434 }
 0x942   : >> { %v1831_v6 = vmul.f32 %v2435_v18, %v3321_v57  ;;  %v1830_v14 = vmul.f32 %v2435_v18, %v3319_v54  ;;  %v1868_v54 = vrot.slane %v3527_v21, 2 }
 0x944   : >> { %v1865_v42 = vpack.c.bf16 %v1831_v6, %v1829_v39  ;;  %v1864_v60 = vpack.c.bf16 %v1830_v14, %v1828_v52 }
 0x946   : >> { %1900 = vmatprep.subr.bf16.mxu0 %v1865_v42  ;;  %v2437_v36 = vpop.eup %2436 }
 0x947   : >> { %1901 = vmatpush1.bf16.xpose.msra.mxu0 %v1864_v60  ;;  %v1833_v26 = vmul.f32 %v2437_v36, %v3331_v2  ;;  %v1832_v58 = vmul.f32 %v2437_v36, %v3329_v16 }
 0x949   : >> { %v2439_v50 = vpop.eup %2438 }
 0x94a   : >> { %v1835_v13 = vmul.f32 %v2439_v50, %v3337_v33  ;;  %v1834_v19 = vmul.f32 %v2439_v50, %v3335_v41 }
 0x94c   : >> { %v1867_v57 = vpack.c.bf16 %v1835_v13, %v1833_v26  ;;  %v1866_v43 = vpack.c.bf16 %v1834_v19, %v1832_v58 }
 0x94e   : >> { %1902 = vmatprep.subr.bf16.mxu0 %v1867_v57 }
 0x94f   : >> { %1903 = vmatpush1.bf16.xpose.msra.mxu0 %v1866_v43 }
 0x956   : >> { %1905 = vmatmul.mubr.bf16.vlgmr.msra.gmra.mrb[4].mxu0 %v1868_v54 }
 0x966   : > { %v2000_v59 = vpop.permute.xlu0 (%p981_p4), %1999 }
 0xa29   : >> { %v1906_v2 = vpop.f32.mrb[4].mxu0 }
 0xa2a   : >> { %v1908_v33 = vpop.f32.mrb[5].mxu0 }
 0xa2b   : >> { %v1910_v49 = vpop.f32.mrb[6].mxu0  ;;  %2145 = vmatprep.subr.msk.mxu1 %vm1918_vm15, %v1908_v33 }
 0xa2c   : >> { %v1911_v16 = vpop.f32.mrb[7].mxu0  ;;  %2146 = vmatpush1.msk.msra.mxu1 %vm1918_vm15, %v1906_v2 }
 0xa2d   : >> { %2147 = vmatmul.mubr.msk.f32.vlgmr.msra.gmra.mrb[64].mxu1 %vm1107_vm14, %v1914_v45 }
 0xafe   : > { %983 = sbr.rel (!%p981_p4) target bundleno = 1330 (0x532), region = 111 }
 0xb00   : >> { %v1991_v41 = vpop.f32.mrb[64].mxu1 }
 0xb01   : >> { %v1996_v8 = vadd.f32 %v3528_v22, %v1991_v41   ;;  %v1993_v15 = vpop.f32.mrb[65].mxu1 }
 0xb02   : >> { %v1997_v30 = vadd.f32 %v3529_v25, %v1993_v15  }
 0xb03   : >> { %v3531_v16 = vmov %v1996_v8  ;;  %v2002_v9 = vadd.f32 (%p981_p4), %v2000_v59, %v1996_v8 }
 0xb04   : >> { %v3530_v15 = vmov %v1997_v30  ;;  %v2003_v44 = vadd.f32 (%p981_p4), %v2000_v59, %v1997_v30 }
 0xb05   : > { %v2004_v17 = vadd.f32 %v2002_v9, %v3533_v12 }
 0xb06   : > { %v2005_v7 = vadd.f32 %v2003_v44, %v3534_v56 }
 0xb07   : > { %v2006_v1 = vmax.f32 %v2004_v17, 0.0 }
 0xb08   : > { %v2007_v27 = vmax.f32 %v2005_v7, 0.0 }
 0xb09   : > { %2008 = vst [vmem:[%s2772_s16] sm:$0xff] %v2006_v1 }
 0xb0a   : > { %2009 = vst [vmem:[%s2772_s16 + $0x8] sm:$0xff] %v2007_v27 }
 0xb0b PF: > { %s19_s30 = sadd.s32 1, %s2459_s30  }
 0xb0c   : > { %p16_p5 = scmp.ge.s32.totalorder %s19_s30, 4  }
 0xb0e   :  { %18 = sbr.rel (!%p16_p5) target bundleno = 1 (0x1), region = 122 }

</bundles_post_ra>
